<compile_context>
chip_gen: v6e
topology: v6e:2x2x1
jax: 0.10.0
libtpu: 0.0.40
codegen_flags: <defaults>
</compile_context>

<pallas_src>
import functools

import jax
import jax.numpy as jnp
from jax.experimental import pallas as pl
from jax.experimental.pallas import tpu as pltpu


# ----------------------------------------------------------------------------
# Helpers
# ----------------------------------------------------------------------------
def _round_up(x, m):
    return ((x + m - 1) // m) * m


def _pad2(x, rows, cols):
    r, c = x.shape
    if r == rows and c == cols:
        return x
    return jnp.pad(x, ((0, rows - r), (0, cols - c)))


def _pick_divisor_tile(total, pref, step=128):
    """Largest multiple of `step` <= pref that divides `total`.

    `total` must be a multiple of `step`.
    """
    t = min(pref, total)
    t = (t // step) * step
    while total % t != 0:
        t -= step
    return max(t, step)


# ----------------------------------------------------------------------------
# Fused GCN layer kernel:  H = act(A_norm @ (X @ W) + b)
#   grid = (N/tm, N/tk).  W and bias resident in VMEM; per step the X k-tile's
#   projection is recomputed in-kernel (cheap: cout <= 128) and accumulated
#   into an f32 scratch.
# ----------------------------------------------------------------------------
def _gcn_layer_kernel(a_ref, x_ref, w_ref, bias_ref, o_ref, acc_ref, *,
                      apply_relu):
    k = pl.program_id(1)

    @pl.when(k == 0)
    def _init():
        acc_ref[...] = jnp.zeros_like(acc_ref)

    # xw_tile = X[k-tile] @ W   (bf16 operands, f32 accumulate)
    xw = jnp.dot(x_ref[...], w_ref[...], preferred_element_type=jnp.float32)
    # acc += A[i-tile, k-tile] @ xw_tile
    acc_ref[...] += jnp.dot(a_ref[...], xw.astype(jnp.bfloat16),
                            preferred_element_type=jnp.float32)

    @pl.when(k == pl.num_programs(1) - 1)
    def _finalize():
        h = acc_ref[...] + bias_ref[...]          # bias add / relu in f32
        if apply_relu:
            h = jnp.maximum(h, 0.0)
        o_ref[...] = h.astype(o_ref.dtype)


def gcn_layer_fused(a_bf, x_p, w_p, b_p, *, apply_relu,
                    tm_pref=512, tk_pref=2048):
    """One GCN layer on pre-padded operands.

    a_bf : (NP, NP)     bf16, NP multiple of 512
    x_p  : (NP, Kp)     bf16, Kp multiple of 128
    w_p  : (Kp, Cp)     bf16, Cp multiple of 128
    b_p  : (1,  Cp)     f32
    returns (NP, Cp) bf16 (rows/cols past the real sizes are don't-care).
    """
    NP = a_bf.shape[0]
    kdim, cout = w_p.shape

    tm = _pick_divisor_tile(NP, tm_pref)
    if NP // tm < 2 and tm >= 256:
        tm //= 2                      # >=2 row programs -> both v7x TCs busy
    tk = _pick_divisor_tile(NP, tk_pref)
    grid = (NP // tm, NP // tk)

    kernel = functools.partial(_gcn_layer_kernel, apply_relu=apply_relu)
    return pl.pallas_call(
        kernel,
        out_shape=jax.ShapeDtypeStruct((NP, cout), jnp.bfloat16),
        grid_spec=pltpu.PrefetchScalarGridSpec(
            num_scalar_prefetch=0,
            grid=grid,
            in_specs=[
                pl.BlockSpec((tm, tk), lambda i, k: (i, k)),      # A tile
                pl.BlockSpec((tk, kdim), lambda i, k: (k, 0)),    # X k-tile
                pl.BlockSpec((kdim, cout), lambda i, k: (0, 0)),  # W resident
                pl.BlockSpec((1, cout), lambda i, k: (0, 0)),     # bias
            ],
            out_specs=pl.BlockSpec((tm, cout), lambda i, k: (i, 0)),
            scratch_shapes=[pltpu.VMEM((tm, cout), jnp.float32)],
        ),
        compiler_params=pltpu.CompilerParams(
            dimension_semantics=("parallel", "arbitrary"),
            vmem_limit_bytes=48 * 1024 * 1024,
        ),
    )(a_bf, x_p, w_p, b_p)


# ----------------------------------------------------------------------------
# MLP link decoder: logits = lin3(relu(lin2(relu(lin1(z_i * z_j)))))
#   Edge dim tiled on the grid; weights resident in VMEM; feature dims and the
#   2-wide logit output padded to 128 lanes (lane-dense stores); bf16 output.
# ----------------------------------------------------------------------------
def _mlp_decoder_kernel(zi_ref, zj_ref, w1_ref, b1_ref, w2_ref, b2_ref,
                        w3_ref, b3_ref, o_ref):
    h = zi_ref[...] * zj_ref[...]                               # bf16 product
    h = jnp.dot(h, w1_ref[...], preferred_element_type=jnp.float32) + b1_ref[...]
    h = jnp.maximum(h, 0.0).astype(jnp.bfloat16)
    h = jnp.dot(h, w2_ref[...], preferred_element_type=jnp.float32) + b2_ref[...]
    h = jnp.maximum(h, 0.0).astype(jnp.bfloat16)
    out = jnp.dot(h, w3_ref[...], preferred_element_type=jnp.float32) + b3_ref[...]
    o_ref[...] = out.astype(o_ref.dtype)


def mlp_decoder(z_src, z_dst, dec, *, te_pref=1024):
    """z_src/z_dst: (E, Hp) bf16 with Hp a multiple of 128.  Returns (E,2) f32."""
    e, hp = z_src.shape
    out_real = dec["w3"].shape[1]          # 2
    op = _round_up(out_real, 128)          # 128 -> lane-dense store
    te = min(te_pref, _round_up(e, 16))    # bf16 rows pack 16/sublane-vreg
    ep = _round_up(e, te)

    zi = _pad2(z_src.astype(jnp.bfloat16), ep, hp)
    zj = _pad2(z_dst.astype(jnp.bfloat16), ep, hp)
    w1 = _pad2(dec["w1"].astype(jnp.bfloat16), hp, hp)
    b1 = _pad2(dec["b1"].astype(jnp.float32), 1, hp)
    w2 = _pad2(dec["w2"].astype(jnp.bfloat16), hp, hp)
    b2 = _pad2(dec["b2"].astype(jnp.float32), 1, hp)
    w3 = _pad2(dec["w3"].astype(jnp.bfloat16), hp, op)
    b3 = _pad2(dec["b3"].astype(jnp.float32), 1, op)

    out = pl.pallas_call(
        _mlp_decoder_kernel,
        out_shape=jax.ShapeDtypeStruct((ep, op), jnp.bfloat16),
        grid_spec=pltpu.PrefetchScalarGridSpec(
            num_scalar_prefetch=0,
            grid=(ep // te,),
            in_specs=[
                pl.BlockSpec((te, hp), lambda i: (i, 0)),   # z_src tile
                pl.BlockSpec((te, hp), lambda i: (i, 0)),   # z_dst tile
                pl.BlockSpec((hp, hp), lambda i: (0, 0)),   # w1 (resident)
                pl.BlockSpec((1, hp), lambda i: (0, 0)),    # b1
                pl.BlockSpec((hp, hp), lambda i: (0, 0)),   # w2
                pl.BlockSpec((1, hp), lambda i: (0, 0)),    # b2
                pl.BlockSpec((hp, op), lambda i: (0, 0)),   # w3 (padded)
                pl.BlockSpec((1, op), lambda i: (0, 0)),    # b3 (padded)
            ],
            out_specs=pl.BlockSpec((te, op), lambda i: (i, 0)),
        ),
        compiler_params=pltpu.CompilerParams(
            dimension_semantics=("parallel",),
            vmem_limit_bytes=48 * 1024 * 1024,
        ),
    )(zi, zj, w1, b1, w2, b2, w3, b3)
    return out[:e, :out_real].astype(jnp.float32)


# ----------------------------------------------------------------------------
# Glue: normalized adjacency, parameter init, full forward
# ----------------------------------------------------------------------------
def build_norm_adj(edge_index, num_nodes):
    """Dense D^{-1/2} (A + I) D^{-1/2} from a (2, E) undirected edge_index.

    Assumes edge_index already contains both directions; duplicate edges are
    deduplicated and pre-existing self-loops keep weight 1.
    """
    src, dst = edge_index[0], edge_index[1]
    a = jnp.zeros((num_nodes, num_nodes), jnp.float32)
    a = a.at[dst, src].set(1.0)
    a = jnp.maximum(a, jnp.eye(num_nodes, dtype=jnp.float32))  # self-loops
    deg = a.sum(axis=1)
    dinv = jnp.where(deg > 0, 1.0 / jnp.sqrt(deg), 0.0)
    return dinv[:, None] * a * dinv[None, :]


def init_params(key, in_channels, hidden_channels):
    ks = jax.random.split(key, 12)

    def glorot(k, fan_in, fan_out):
        scale = jnp.sqrt(6.0 / (fan_in + fan_out))
        return jax.random.uniform(k, (fan_in, fan_out), jnp.float32, -scale, scale)

    h = hidden_channels
    enc = {
        "w1": glorot(ks[0], in_channels, h), "b1": jnp.zeros((1, h), jnp.float32),
        "w2": glorot(ks[1], h, h),           "b2": jnp.zeros((1, h), jnp.float32),
        "w3": glorot(ks[2], h, h),           "b3": jnp.zeros((1, h), jnp.float32),
    }
    dec = {
        "w1": glorot(ks[3], h, h), "b1": 0.01 * jax.random.normal(ks[6], (1, h), jnp.float32),
        "w2": glorot(ks[4], h, h), "b2": 0.01 * jax.random.normal(ks[7], (1, h), jnp.float32),
        "w3": glorot(ks[5], h, 2), "b3": 0.01 * jax.random.normal(ks[8], (1, 2), jnp.float32),
    }
    return enc, dec


def gcn_model_forward(enc, dec, x, edge_index, edge_label_index):
    n, cin = x.shape
    hidden = enc["w1"].shape[1]

    # Padded sizes (N padded to a multiple of 512 so the 512/2048-class tiles
    # divide it; feature dims padded to 128 lanes).
    NP = _round_up(max(n, 1), 512)
    cin_p = _round_up(cin, 128)
    h_p = _round_up(hidden, 128)

    # ---- one-time (hoisted) cast + pad of A_norm, X and encoder weights ----
    a_norm = build_norm_adj(edge_index, n)
    a_bf = _pad2(a_norm.astype(jnp.bfloat16), NP, NP)
    x_p = _pad2(x.astype(jnp.bfloat16), NP, cin_p)

    w1 = _pad2(enc["w1"].astype(jnp.bfloat16), cin_p, h_p)
    b1 = _pad2(enc["b1"].astype(jnp.float32), 1, h_p)
    w2 = _pad2(enc["w2"].astype(jnp.bfloat16), h_p, h_p)
    b2 = _pad2(enc["b2"].astype(jnp.float32), 1, h_p)
    w3 = _pad2(enc["w3"].astype(jnp.bfloat16), h_p, h_p)
    b3 = _pad2(enc["b3"].astype(jnp.float32), 1, h_p)

    # Encoder: relu(GCN1) -> relu(GCN2) -> GCN3, all on padded bf16 arrays.
    z = gcn_layer_fused(a_bf, x_p, w1, b1, apply_relu=True)
    z = gcn_layer_fused(a_bf, z, w2, b2, apply_relu=True)
    z = gcn_layer_fused(a_bf, z, w3, b3, apply_relu=False)   # (NP, h_p) bf16

    # Gather endpoint embeddings (bf16 glue), then decode in a Pallas kernel.
    src, dst = edge_label_index[0], edge_label_index[1]
    z_src = jnp.take(z, src, axis=0)
    z_dst = jnp.take(z, dst, axis=0)
    return mlp_decoder(z_src, z_dst, dec)


# ----------------------------------------------------------------------------
if __name__ == "__main__":
    key = jax.random.PRNGKey(0)
    k_x, k_e, k_lbl, k_p = jax.random.split(key, 4)

    num_nodes = 16
    in_channels = 8
    hidden_channels = 32
    num_edges = 24          # directed entries (undirected pairs duplicated)
    num_label_edges = 8

    # Node features [N, Cin]
    x = jax.random.normal(k_x, (num_nodes, in_channels), jnp.float32)

    # Undirected synthetic graph: sample pairs, add both directions.
    half = num_edges // 2
    e_src = jax.random.randint(k_e, (half,), 0, num_nodes)
    e_dst = (e_src + jax.random.randint(jax.random.fold_in(k_e, 1), (half,),
                                        1, num_nodes)) % num_nodes
    edge_index = jnp.stack([jnp.concatenate([e_src, e_dst]),
                            jnp.concatenate([e_dst, e_src])], axis=0)

    # Edge label pairs to score: (2, E_lbl)
    edge_label_index = jax.random.randint(k_lbl, (2, num_label_edges), 0, num_nodes)

    enc_params, dec_params = init_params(k_p, in_channels, hidden_channels)

    fwd = jax.jit(gcn_model_forward)
    logits = fwd(enc_params, dec_params, x, edge_index, edge_label_index)
    logits = jax.block_until_ready(logits)

    assert logits.shape == (num_label_edges, 2)
    assert bool(jnp.all(jnp.isfinite(logits)))
    print("KERNEL_OK")
</pallas_src>

<mosaic_0001>
module attributes {stable_mosaic.version = 11 : i64} {
  func.func @_gcn_layer_kernel(%arg0: i32, %arg1: i32, %arg2: memref<256x512xbf16, #tpu.memory_space<vmem>>, %arg3: memref<512x128xbf16, #tpu.memory_space<vmem>>, %arg4: memref<128x128xbf16, #tpu.memory_space<vmem>>, %arg5: memref<1x128xf32, #tpu.memory_space<vmem>>, %arg6: memref<256x128xbf16, #tpu.memory_space<vmem>>, %arg7: memref<256x128xf32, #tpu.memory_space<vmem>>) attributes {dimension_semantics = [#tpu.dimension_semantics<parallel>, #tpu.dimension_semantics<arbitrary>], iteration_bounds = array<i64: 2, 1>, scalar_prefetch = 0 : i64, scratch_operands = 1 : i64, tpu.core_type = #tpu.core_type<tc>, window_params = [{transform_indices = @transform_0, window_bounds = array<i64: 256, 512>}, {transform_indices = @transform_1, window_bounds = array<i64: 512, 128>}, {pipeline_mode = #tpu.pipeline_mode<synchronous>, transform_indices = @transform_2, window_bounds = array<i64: 128, 128>}, {pipeline_mode = #tpu.pipeline_mode<synchronous>, transform_indices = @transform_3, window_bounds = array<i64: 1, 128>}, {transform_indices = @transform_4, window_bounds = array<i64: 256, 128>}]} {
    %c0_i32 = arith.constant 0 : i32
    %0 = arith.cmpi eq, %arg1, %c0_i32 : i32
    %1 = arith.extui %0 : i1 to i32
    %c0_i32_0 = arith.constant 0 : i32
    %2 = arith.cmpi ne, %1, %c0_i32_0 : i32
    scf.if %2 {
      %cst_13 = arith.constant 0.000000e+00 : f32
      %15 = vector.broadcast %cst_13 : f32 to vector<256x128xf32>
      %c0_14 = arith.constant 0 : index
      %c0_15 = arith.constant 0 : index
      %16 = vector.load %arg7[%c0_14, %c0_15] : memref<256x128xf32, #tpu.memory_space<vmem>>, vector<256x128xf32>
      tpu.vector_store %arg7[%c0_14, %c0_15], %15 {strides = array<i32>} : memref<256x128xf32, #tpu.memory_space<vmem>>, vector<256x128xf32>,
    } else {
    }
    %c0 = arith.constant 0 : index
    %c0_1 = arith.constant 0 : index
    %3 = vector.load %arg3[%c0, %c0_1] : memref<512x128xbf16, #tpu.memory_space<vmem>>, vector<512x128xbf16>
    %c0_2 = arith.constant 0 : index
    %c0_3 = arith.constant 0 : index
    %4 = vector.load %arg4[%c0_2, %c0_3] : memref<128x128xbf16, #tpu.memory_space<vmem>>, vector<128x128xbf16>
    %cst = arith.constant dense<0.000000e+00> : vector<512x128xf32>
    %5 = tpu.matmul %3, %4, %cst {dimension_numbers = #tpu.dot_dimension_numbers<[1], [0], [0], [1], [0, 0, 1, 1], [], []>} : vector<512x128xbf16>, vector<128x128xbf16>, vector<512x128xf32> -> vector<512x128xf32>
    %c0_4 = arith.constant 0 : index
    %c0_5 = arith.constant 0 : index
    %6 = vector.load %arg7[%c0_4, %c0_5] : memref<256x128xf32, #tpu.memory_space<vmem>>, vector<256x128xf32>
    %c0_6 = arith.constant 0 : index
    %c0_7 = arith.constant 0 : index
    %7 = vector.load %arg2[%c0_6, %c0_7] : memref<256x512xbf16, #tpu.memory_space<vmem>>, vector<256x512xbf16>
    %8 = arith.truncf %5 : vector<512x128xf32> to vector<512x128xbf16>
    %cst_8 = arith.constant dense<0.000000e+00> : vector<256x128xf32>
    %9 = tpu.matmul %7, %8, %cst_8 {dimension_numbers = #tpu.dot_dimension_numbers<[1], [0], [0], [1], [0, 0, 1, 1], [], []>} : vector<256x512xbf16>, vector<512x128xbf16>, vector<256x128xf32> -> vector<256x128xf32>
    %10 = arith.addf %6, %9 : vector<256x128xf32>
    %c0_9 = arith.constant 0 : index
    %c0_10 = arith.constant 0 : index
    %11 = vector.load %arg7[%c0_9, %c0_10] : memref<256x128xf32, #tpu.memory_space<vmem>>, vector<256x128xf32>
    tpu.vector_store %arg7[%c0_9, %c0_10], %10 {strides = array<i32>} : memref<256x128xf32, #tpu.memory_space<vmem>>, vector<256x128xf32>,
    %c0_i32_11 = arith.constant 0 : i32
    %12 = arith.cmpi eq, %arg1, %c0_i32_11 : i32
    %13 = arith.extui %12 : i1 to i32
    %c0_i32_12 = arith.constant 0 : i32
    %14 = arith.cmpi ne, %13, %c0_i32_12 : i32
    scf.if %14 {
      %c0_13 = arith.constant 0 : index
      %c0_14 = arith.constant 0 : index
      %15 = vector.load %arg7[%c0_13, %c0_14] : memref<256x128xf32, #tpu.memory_space<vmem>>, vector<256x128xf32>
      %c0_15 = arith.constant 0 : index
      %c0_16 = arith.constant 0 : index
      %16 = vector.load %arg5[%c0_15, %c0_16] : memref<1x128xf32, #tpu.memory_space<vmem>>, vector<1x128xf32>
      %17 = vector.broadcast %16 : vector<1x128xf32> to vector<256x128xf32>
      %18 = arith.addf %15, %17 : vector<256x128xf32>
      %cst_17 = arith.constant 0.000000e+00 : f32
      %19 = vector.broadcast %cst_17 : f32 to vector<256x128xf32>
      %20 = arith.maximumf %18, %19 : vector<256x128xf32>
      %21 = arith.truncf %20 : vector<256x128xf32> to vector<256x128xbf16>
      %c0_18 = arith.constant 0 : index
      %c0_19 = arith.constant 0 : index
      %22 = vector.load %arg6[%c0_18, %c0_19] : memref<256x128xbf16, #tpu.memory_space<vmem>>, vector<256x128xbf16>
      tpu.vector_store %arg6[%c0_18, %c0_19], %21 {strides = array<i32>} : memref<256x128xbf16, #tpu.memory_space<vmem>>, vector<256x128xbf16>,
    } else {
    }
    return
  }
  func.func @transform_0(%arg0: i32, %arg1: i32) -> (i32, i32) {
    %c0_i32 = arith.constant 0 : i32
    return %arg0, %arg1 : i32, i32
  }
  func.func @transform_1(%arg0: i32, %arg1: i32) -> (i32, i32) {
    %c0_i32 = arith.constant 0 : i32
    %c0_i32_0 = arith.constant 0 : i32
    return %arg1, %c0_i32 : i32, i32
  }
  func.func @transform_2(%arg0: i32, %arg1: i32) -> (i32, i32) {
    %c0_i32 = arith.constant 0 : i32
    %c0_i32_0 = arith.constant 0 : i32
    %c0_i32_1 = arith.constant 0 : i32
    return %c0_i32, %c0_i32_0 : i32, i32
  }
  func.func @transform_3(%arg0: i32, %arg1: i32) -> (i32, i32) {
    %c0_i32 = arith.constant 0 : i32
    %c0_i32_0 = arith.constant 0 : i32
    %c0_i32_1 = arith.constant 0 : i32
    return %c0_i32, %c0_i32_0 : i32, i32
  }
  func.func @transform_4(%arg0: i32, %arg1: i32) -> (i32, i32) {
    %c0_i32 = arith.constant 0 : i32
    %c0_i32_0 = arith.constant 0 : i32
    return %arg0, %c0_i32 : i32, i32
  }
}

module attributes {stable_mosaic.version = 11 : i64} {
  func.func @_gcn_layer_kernel(%arg0: i32, %arg1: i32, %arg2: memref<256x512xbf16, #tpu.memory_space<vmem>>, %arg3: memref<512x128xbf16, #tpu.memory_space<vmem>>, %arg4: memref<128x128xbf16, #tpu.memory_space<vmem>>, %arg5: memref<1x128xf32, #tpu.memory_space<vmem>>, %arg6: memref<256x128xbf16, #tpu.memory_space<vmem>>, %arg7: memref<256x128xf32, #tpu.memory_space<vmem>>) attributes {dimension_semantics = [#tpu.dimension_semantics<parallel>, #tpu.dimension_semantics<arbitrary>], iteration_bounds = array<i64: 2, 1>, scalar_prefetch = 0 : i64, scratch_operands = 1 : i64, tpu.core_type = #tpu.core_type<tc>, window_params = [{transform_indices = @transform_0, window_bounds = array<i64: 256, 512>}, {transform_indices = @transform_1, window_bounds = array<i64: 512, 128>}, {pipeline_mode = #tpu.pipeline_mode<synchronous>, transform_indices = @transform_2, window_bounds = array<i64: 128, 128>}, {pipeline_mode = #tpu.pipeline_mode<synchronous>, transform_indices = @transform_3, window_bounds = array<i64: 1, 128>}, {transform_indices = @transform_4, window_bounds = array<i64: 256, 128>}]} {
    %c0_i32 = arith.constant 0 : i32
    %0 = arith.cmpi eq, %arg1, %c0_i32 : i32
    %1 = arith.extui %0 : i1 to i32
    %c0_i32_0 = arith.constant 0 : i32
    %2 = arith.cmpi ne, %1, %c0_i32_0 : i32
    scf.if %2 {
      %cst_13 = arith.constant 0.000000e+00 : f32
      %15 = vector.broadcast %cst_13 : f32 to vector<256x128xf32>
      %c0_14 = arith.constant 0 : index
      %c0_15 = arith.constant 0 : index
      %16 = vector.load %arg7[%c0_14, %c0_15] : memref<256x128xf32, #tpu.memory_space<vmem>>, vector<256x128xf32>
      tpu.vector_store %arg7[%c0_14, %c0_15], %15 {strides = array<i32>} : memref<256x128xf32, #tpu.memory_space<vmem>>, vector<256x128xf32>,
    } else {
    }
    %c0 = arith.constant 0 : index
    %c0_1 = arith.constant 0 : index
    %3 = vector.load %arg3[%c0, %c0_1] : memref<512x128xbf16, #tpu.memory_space<vmem>>, vector<512x128xbf16>
    %c0_2 = arith.constant 0 : index
    %c0_3 = arith.constant 0 : index
    %4 = vector.load %arg4[%c0_2, %c0_3] : memref<128x128xbf16, #tpu.memory_space<vmem>>, vector<128x128xbf16>
    %cst = arith.constant dense<0.000000e+00> : vector<512x128xf32>
    %5 = tpu.matmul %3, %4, %cst {dimension_numbers = #tpu.dot_dimension_numbers<[1], [0], [0], [1], [0, 0, 1, 1], [], []>} : vector<512x128xbf16>, vector<128x128xbf16>, vector<512x128xf32> -> vector<512x128xf32>
    %c0_4 = arith.constant 0 : index
    %c0_5 = arith.constant 0 : index
    %6 = vector.load %arg7[%c0_4, %c0_5] : memref<256x128xf32, #tpu.memory_space<vmem>>, vector<256x128xf32>
    %c0_6 = arith.constant 0 : index
    %c0_7 = arith.constant 0 : index
    %7 = vector.load %arg2[%c0_6, %c0_7] : memref<256x512xbf16, #tpu.memory_space<vmem>>, vector<256x512xbf16>
    %8 = arith.truncf %5 : vector<512x128xf32> to vector<512x128xbf16>
    %cst_8 = arith.constant dense<0.000000e+00> : vector<256x128xf32>
    %9 = tpu.matmul %7, %8, %cst_8 {dimension_numbers = #tpu.dot_dimension_numbers<[1], [0], [0], [1], [0, 0, 1, 1], [], []>} : vector<256x512xbf16>, vector<512x128xbf16>, vector<256x128xf32> -> vector<256x128xf32>
    %10 = arith.addf %6, %9 : vector<256x128xf32>
    %c0_9 = arith.constant 0 : index
    %c0_10 = arith.constant 0 : index
    %11 = vector.load %arg7[%c0_9, %c0_10] : memref<256x128xf32, #tpu.memory_space<vmem>>, vector<256x128xf32>
    tpu.vector_store %arg7[%c0_9, %c0_10], %10 {strides = array<i32>} : memref<256x128xf32, #tpu.memory_space<vmem>>, vector<256x128xf32>,
    %c0_i32_11 = arith.constant 0 : i32
    %12 = arith.cmpi eq, %arg1, %c0_i32_11 : i32
    %13 = arith.extui %12 : i1 to i32
    %c0_i32_12 = arith.constant 0 : i32
    %14 = arith.cmpi ne, %13, %c0_i32_12 : i32
    scf.if %14 {
      %c0_13 = arith.constant 0 : index
      %c0_14 = arith.constant 0 : index
      %15 = vector.load %arg7[%c0_13, %c0_14] : memref<256x128xf32, #tpu.memory_space<vmem>>, vector<256x128xf32>
      %c0_15 = arith.constant 0 : index
      %c0_16 = arith.constant 0 : index
      %16 = vector.load %arg5[%c0_15, %c0_16] : memref<1x128xf32, #tpu.memory_space<vmem>>, vector<1x128xf32>
      %17 = vector.broadcast %16 : vector<1x128xf32> to vector<256x128xf32>
      %18 = arith.addf %15, %17 : vector<256x128xf32>
      %19 = arith.truncf %18 : vector<256x128xf32> to vector<256x128xbf16>
      %c0_17 = arith.constant 0 : index
      %c0_18 = arith.constant 0 : index
      %20 = vector.load %arg6[%c0_17, %c0_18] : memref<256x128xbf16, #tpu.memory_space<vmem>>, vector<256x128xbf16>
      tpu.vector_store %arg6[%c0_17, %c0_18], %19 {strides = array<i32>} : memref<256x128xbf16, #tpu.memory_space<vmem>>, vector<256x128xbf16>,
    } else {
    }
    return
  }
  func.func @transform_0(%arg0: i32, %arg1: i32) -> (i32, i32) {
    %c0_i32 = arith.constant 0 : i32
    return %arg0, %arg1 : i32, i32
  }
  func.func @transform_1(%arg0: i32, %arg1: i32) -> (i32, i32) {
    %c0_i32 = arith.constant 0 : i32
    %c0_i32_0 = arith.constant 0 : i32
    return %arg1, %c0_i32 : i32, i32
  }
  func.func @transform_2(%arg0: i32, %arg1: i32) -> (i32, i32) {
    %c0_i32 = arith.constant 0 : i32
    %c0_i32_0 = arith.constant 0 : i32
    %c0_i32_1 = arith.constant 0 : i32
    return %c0_i32, %c0_i32_0 : i32, i32
  }
  func.func @transform_3(%arg0: i32, %arg1: i32) -> (i32, i32) {
    %c0_i32 = arith.constant 0 : i32
    %c0_i32_0 = arith.constant 0 : i32
    %c0_i32_1 = arith.constant 0 : i32
    return %c0_i32, %c0_i32_0 : i32, i32
  }
  func.func @transform_4(%arg0: i32, %arg1: i32) -> (i32, i32) {
    %c0_i32 = arith.constant 0 : i32
    %c0_i32_0 = arith.constant 0 : i32
    return %arg0, %c0_i32 : i32, i32
  }
}

module attributes {stable_mosaic.version = 11 : i64} {
  func.func @_mlp_decoder_kernel(%arg0: i32, %arg1: memref<16x128xbf16, #tpu.memory_space<vmem>>, %arg2: memref<16x128xbf16, #tpu.memory_space<vmem>>, %arg3: memref<128x128xbf16, #tpu.memory_space<vmem>>, %arg4: memref<1x128xf32, #tpu.memory_space<vmem>>, %arg5: memref<128x128xbf16, #tpu.memory_space<vmem>>, %arg6: memref<1x128xf32, #tpu.memory_space<vmem>>, %arg7: memref<128x128xbf16, #tpu.memory_space<vmem>>, %arg8: memref<1x128xf32, #tpu.memory_space<vmem>>, %arg9: memref<16x128xbf16, #tpu.memory_space<vmem>>) attributes {dimension_semantics = [#tpu.dimension_semantics<parallel>], iteration_bounds = array<i64: 1>, scalar_prefetch = 0 : i64, scratch_operands = 0 : i64, tpu.core_type = #tpu.core_type<tc>, window_params = [{transform_indices = @transform_0, window_bounds = array<i64: 16, 128>}, {transform_indices = @transform_1, window_bounds = array<i64: 16, 128>}, {pipeline_mode = #tpu.pipeline_mode<synchronous>, transform_indices = @transform_2, window_bounds = array<i64: 128, 128>}, {pipeline_mode = #tpu.pipeline_mode<synchronous>, transform_indices = @transform_3, window_bounds = array<i64: 1, 128>}, {pipeline_mode = #tpu.pipeline_mode<synchronous>, transform_indices = @transform_4, window_bounds = array<i64: 128, 128>}, {pipeline_mode = #tpu.pipeline_mode<synchronous>, transform_indices = @transform_5, window_bounds = array<i64: 1, 128>}, {pipeline_mode = #tpu.pipeline_mode<synchronous>, transform_indices = @transform_6, window_bounds = array<i64: 128, 128>}, {pipeline_mode = #tpu.pipeline_mode<synchronous>, transform_indices = @transform_7, window_bounds = array<i64: 1, 128>}, {transform_indices = @transform_8, window_bounds = array<i64: 16, 128>}]} {
    %c0 = arith.constant 0 : index
    %c0_0 = arith.constant 0 : index
    %0 = vector.load %arg1[%c0, %c0_0] : memref<16x128xbf16, #tpu.memory_space<vmem>>, vector<16x128xbf16>
    %c0_1 = arith.constant 0 : index
    %c0_2 = arith.constant 0 : index
    %1 = vector.load %arg2[%c0_1, %c0_2] : memref<16x128xbf16, #tpu.memory_space<vmem>>, vector<16x128xbf16>
    %2 = arith.mulf %0, %1 : vector<16x128xbf16>
    %c0_3 = arith.constant 0 : index
    %c0_4 = arith.constant 0 : index
    %3 = vector.load %arg3[%c0_3, %c0_4] : memref<128x128xbf16, #tpu.memory_space<vmem>>, vector<128x128xbf16>
    %cst = arith.constant dense<0.000000e+00> : vector<16x128xf32>
    %4 = tpu.matmul %2, %3, %cst {dimension_numbers = #tpu.dot_dimension_numbers<[1], [0], [0], [1], [0, 0, 1, 1], [], []>} : vector<16x128xbf16>, vector<128x128xbf16>, vector<16x128xf32> -> vector<16x128xf32>
    %c0_5 = arith.constant 0 : index
    %c0_6 = arith.constant 0 : index
    %5 = vector.load %arg4[%c0_5, %c0_6] : memref<1x128xf32, #tpu.memory_space<vmem>>, vector<1x128xf32>
    %6 = vector.broadcast %5 : vector<1x128xf32> to vector<16x128xf32>
    %7 = arith.addf %4, %6 : vector<16x128xf32>
    %cst_7 = arith.constant 0.000000e+00 : f32
    %8 = vector.broadcast %cst_7 : f32 to vector<16x128xf32>
    %9 = arith.maximumf %7, %8 : vector<16x128xf32>
    %10 = arith.truncf %9 : vector<16x128xf32> to vector<16x128xbf16>
    %c0_8 = arith.constant 0 : index
    %c0_9 = arith.constant 0 : index
    %11 = vector.load %arg5[%c0_8, %c0_9] : memref<128x128xbf16, #tpu.memory_space<vmem>>, vector<128x128xbf16>
    %cst_10 = arith.constant dense<0.000000e+00> : vector<16x128xf32>
    %12 = tpu.matmul %10, %11, %cst_10 {dimension_numbers = #tpu.dot_dimension_numbers<[1], [0], [0], [1], [0, 0, 1, 1], [], []>} : vector<16x128xbf16>, vector<128x128xbf16>, vector<16x128xf32> -> vector<16x128xf32>
    %c0_11 = arith.constant 0 : index
    %c0_12 = arith.constant 0 : index
    %13 = vector.load %arg6[%c0_11, %c0_12] : memref<1x128xf32, #tpu.memory_space<vmem>>, vector<1x128xf32>
    %14 = vector.broadcast %13 : vector<1x128xf32> to vector<16x128xf32>
    %15 = arith.addf %12, %14 : vector<16x128xf32>
    %cst_13 = arith.constant 0.000000e+00 : f32
    %16 = vector.broadcast %cst_13 : f32 to vector<16x128xf32>
    %17 = arith.maximumf %15, %16 : vector<16x128xf32>
    %18 = arith.truncf %17 : vector<16x128xf32> to vector<16x128xbf16>
    %c0_14 = arith.constant 0 : index
    %c0_15 = arith.constant 0 : index
    %19 = vector.load %arg7[%c0_14, %c0_15] : memref<128x128xbf16, #tpu.memory_space<vmem>>, vector<128x128xbf16>
    %cst_16 = arith.constant dense<0.000000e+00> : vector<16x128xf32>
    %20 = tpu.matmul %18, %19, %cst_16 {dimension_numbers = #tpu.dot_dimension_numbers<[1], [0], [0], [1], [0, 0, 1, 1], [], []>} : vector<16x128xbf16>, vector<128x128xbf16>, vector<16x128xf32> -> vector<16x128xf32>
    %c0_17 = arith.constant 0 : index
    %c0_18 = arith.constant 0 : index
    %21 = vector.load %arg8[%c0_17, %c0_18] : memref<1x128xf32, #tpu.memory_space<vmem>>, vector<1x128xf32>
    %22 = vector.broadcast %21 : vector<1x128xf32> to vector<16x128xf32>
    %23 = arith.addf %20, %22 : vector<16x128xf32>
    %24 = arith.truncf %23 : vector<16x128xf32> to vector<16x128xbf16>
    %c0_19 = arith.constant 0 : index
    %c0_20 = arith.constant 0 : index
    %25 = vector.load %arg9[%c0_19, %c0_20] : memref<16x128xbf16, #tpu.memory_space<vmem>>, vector<16x128xbf16>
    tpu.vector_store %arg9[%c0_19, %c0_20], %24 {strides = array<i32>} : memref<16x128xbf16, #tpu.memory_space<vmem>>, vector<16x128xbf16>,
    return
  }
  func.func @transform_0(%arg0: i32) -> (i32, i32) {
    %c0_i32 = arith.constant 0 : i32
    %c0_i32_0 = arith.constant 0 : i32
    return %arg0, %c0_i32 : i32, i32
  }
  func.func @transform_1(%arg0: i32) -> (i32, i32) {
    %c0_i32 = arith.constant 0 : i32
    %c0_i32_0 = arith.constant 0 : i32
    return %arg0, %c0_i32 : i32, i32
  }
  func.func @transform_2(%arg0: i32) -> (i32, i32) {
    %c0_i32 = arith.constant 0 : i32
    %c0_i32_0 = arith.constant 0 : i32
    %c0_i32_1 = arith.constant 0 : i32
    return %c0_i32, %c0_i32_0 : i32, i32
  }
  func.func @transform_3(%arg0: i32) -> (i32, i32) {
    %c0_i32 = arith.constant 0 : i32
    %c0_i32_0 = arith.constant 0 : i32
    %c0_i32_1 = arith.constant 0 : i32
    return %c0_i32, %c0_i32_0 : i32, i32
  }
  func.func @transform_4(%arg0: i32) -> (i32, i32) {
    %c0_i32 = arith.constant 0 : i32
    %c0_i32_0 = arith.constant 0 : i32
    %c0_i32_1 = arith.constant 0 : i32
    return %c0_i32, %c0_i32_0 : i32, i32
  }
  func.func @transform_5(%arg0: i32) -> (i32, i32) {
    %c0_i32 = arith.constant 0 : i32
    %c0_i32_0 = arith.constant 0 : i32
    %c0_i32_1 = arith.constant 0 : i32
    return %c0_i32, %c0_i32_0 : i32, i32
  }
  func.func @transform_6(%arg0: i32) -> (i32, i32) {
    %c0_i32 = arith.constant 0 : i32
    %c0_i32_0 = arith.constant 0 : i32
    %c0_i32_1 = arith.constant 0 : i32
    return %c0_i32, %c0_i32_0 : i32, i32
  }
  func.func @transform_7(%arg0: i32) -> (i32, i32) {
    %c0_i32 = arith.constant 0 : i32
    %c0_i32_0 = arith.constant 0 : i32
    %c0_i32_1 = arith.constant 0 : i32
    return %c0_i32, %c0_i32_0 : i32, i32
  }
  func.func @transform_8(%arg0: i32) -> (i32, i32) {
    %c0_i32 = arith.constant 0 : i32
    %c0_i32_0 = arith.constant 0 : i32
    return %arg0, %c0_i32 : i32, i32
  }
}

</mosaic_0001>

<bundles_post_ra>
// kernel: gcn_model_forward.7
= control target key start
LH: loop header
LB: loop body
LE: loop exit
PB: predicated region body
PF: predicated region fallthrough
CT: control target
= control target key end

     0   :  { %v548_v0 = vmov 0.0   ;;  %vm549_vm0 = vmmov 0   ;;  %s721_s2 = inlined_call_operand.vmem [shape: bf16[128,128], index: 2, kind: input, shape index: {}]   ;;  %s722_s4 = inlined_call_operand.vmem [shape: bf16[128,128], index: 4, kind: input, shape index: {}]   ;;  %s723_s0 = inlined_call_operand.vmem [shape: bf16[16,128], index: 0, kind: input, shape index: {}]   ;;  %s724_s1 = inlined_call_operand.vmem [shape: bf16[16,128], index: 1, kind: input, shape index: {}]   ;;  %s725_s6 = inlined_call_operand.vmem [shape: bf16[128,128], index: 6, kind: input, shape index: {}]   ;;  %s726_s3 = inlined_call_operand.vmem [shape: f32[1,128], index: 3, kind: input, shape index: {}]   ;;  %s727_s5 = inlined_call_operand.vmem [shape: f32[1,128], index: 5, kind: input, shape index: {}]   ;;  %s728_s7 = inlined_call_operand.vmem [shape: f32[1,128], index: 7, kind: input, shape index: {}]   ;;  %s729_s8 = inlined_call_operand.vmem [shape: bf16[16,128], index: 8, kind: output, shape index: {}]  }
   0x1   :  { %462 = vmatprep.subr.bf16.mxu0 %v548_v0  ;;  %v524_v1 = vld [vmem:[%s721_s2 + $0x38] sm:$0xff]   ;;  %478 = vmatprep.mubr.msk.bf16.mxu0 %vm549_vm0, %v548_v0  ;;  %v525_v2 = vld [vmem:[%s721_s2 + $0x30] sm:$0xff]   ;;  %v526_v3 = vld [vmem:[%s721_s2 + $0x28] sm:$0xff]  }
   0x2   :  { %482 = vmatprep.subr.bf16.mxu1 %v548_v0  ;;  %498 = vmatprep.mubr.msk.bf16.mxu1 %vm549_vm0, %v548_v0  ;;  %v527_v4 = vld [vmem:[%s721_s2 + $0x20] sm:$0xff]   ;;  %v532_v5 = vld [vmem:[%s722_s4 + $0x38] sm:$0xff]   ;;  %v533_v6 = vld [vmem:[%s722_s4 + $0x30] sm:$0xff]  }
   0x3   :  { %463 = vmatpush3.bf16.msra.mxu0 %v524_v1  ;;  %483 = vmatpush3.bf16.msra.mxu1 %v532_v5  ;;  %v528_v7 = vld [vmem:[%s721_s2 + $0x18] sm:$0xff]   ;;  %v534_v8 = vld [vmem:[%s722_s4 + $0x28] sm:$0xff]   ;;  %v529_v9 = vld [vmem:[%s721_s2 + $0x10] sm:$0xff]  }
   0x4   :  { %464 = vmatprep.subr.bf16.mxu0 %v548_v0  ;;  %484 = vmatprep.subr.bf16.mxu1 %v548_v0  ;;  %v535_v10 = vld [vmem:[%s722_s4 + $0x20] sm:$0xff]   ;;  %v530_v11 = vld [vmem:[%s721_s2 + $0x8] sm:$0xff]   ;;  %v536_v16 = vld [vmem:[%s722_s4 + $0x18] sm:$0xff]  }
   0x5   :  { %v30_v12 = vld [vmem:[%s723_s0] sm:$0xf]  ;;  %v31_v13 = vld [vmem:[%s723_s0 + $0x4] sm:$0xf]  ;;  %v537_v21 = vld [vmem:[%s722_s4 + $0x10] sm:$0xff]  }
   0x6   :  { %v32_v14 = vld [vmem:[%s724_s1] sm:$0xf]  ;;  %v33_v15 = vld [vmem:[%s724_s1 + $0x4] sm:$0xf]  ;;  %v538_v22 = vld [vmem:[%s722_s4 + $0x8] sm:$0xff]  }
   0x7   :  { %465 = vmatpush3.bf16.msra.mxu0 %v525_v2  ;;  %485 = vmatpush3.bf16.msra.mxu1 %v533_v6  ;;  %v34_v17 = vmul.bf16 %v32_v14, %v30_v12  ;;  %v35_v18 = vmul.bf16 %v33_v15, %v31_v13  ;;  %v531_v19 = vld [vmem:[%s721_s2] sm:$0xff]   ;;  %v540_v24 = vld [vmem:[%s725_s6 + $0x38] sm:$0xff]   ;;  %v541_v25 = vld [vmem:[%s725_s6 + $0x30] sm:$0xff]  }
   0x8   :  { %466 = vmatprep.subr.bf16.mxu0 %v548_v0  ;;  %486 = vmatprep.subr.bf16.mxu1 %v548_v0  ;;  %v539_v23 = vld [vmem:[%s722_s4] sm:$0xff]   ;;  %v542_v26 = vld [vmem:[%s725_s6 + $0x28] sm:$0xff]   ;;  %v544_v28 = vld [vmem:[%s725_s6 + $0x18] sm:$0xff]  }
   0x9   :  { %v399_v20 = vcombine.low %v34_v17, %v35_v18  ;;  %v543_v27 = vld [vmem:[%s725_s6 + $0x20] sm:$0xff]   ;;  %v545_v39 = vld [vmem:[%s725_s6 + $0x10] sm:$0xff]   ;;  %v546_v40 = vld [vmem:[%s725_s6 + $0x8] sm:$0xff]  }
   0xa   :  { %v398_v29 = vld [vmem:[%s726_s3] ss:$0 sm:$0xff] }
   0xb   :  { %467 = vmatpush3.bf16.msra.mxu0 %v526_v3  ;;  %487 = vmatpush3.bf16.msra.mxu1 %v534_v8  ;;  %v547_v41 = vld [vmem:[%s725_s6] sm:$0xff]  }
   0xc   :  { %468 = vmatprep.subr.bf16.mxu0 %v548_v0  ;;  %488 = vmatprep.subr.bf16.mxu1 %v548_v0  ;;  %v408_v42 = vld [vmem:[%s727_s5] ss:$0 sm:$0xff] }
   0xd   :  { %v417_v53 = vld [vmem:[%s728_s7] ss:$0 sm:$0xff] }
   0xf   :  { %469 = vmatpush3.bf16.msra.mxu0 %v527_v4  ;;  %489 = vmatpush3.bf16.msra.mxu1 %v535_v10 }
  0x10   :  { %470 = vmatprep.subr.bf16.mxu0 %v548_v0  ;;  %490 = vmatprep.subr.bf16.mxu1 %v548_v0 }
  0x13   :  { %471 = vmatpush3.bf16.msra.mxu0 %v528_v7  ;;  %491 = vmatpush3.bf16.msra.mxu1 %v536_v16 }
  0x14   :  { %472 = vmatprep.subr.bf16.mxu0 %v548_v0  ;;  %492 = vmatprep.subr.bf16.mxu1 %v548_v0 }
  0x17   :  { %473 = vmatpush3.bf16.msra.mxu0 %v529_v9  ;;  %493 = vmatpush3.bf16.msra.mxu1 %v537_v21 }
  0x18   :  { %474 = vmatprep.subr.bf16.mxu0 %v548_v0  ;;  %494 = vmatprep.subr.bf16.mxu1 %v548_v0 }
  0x1b   :  { %475 = vmatpush3.bf16.msra.mxu0 %v530_v11  ;;  %495 = vmatpush3.bf16.msra.mxu1 %v538_v22 }
  0x1c   :  { %476 = vmatprep.subr.bf16.mxu0 %v548_v0  ;;  %496 = vmatprep.subr.bf16.mxu1 %v548_v0 }
  0x1f   :  { %477 = vmatpush3.bf16.msra.mxu0 %v531_v19  ;;  %497 = vmatpush3.bf16.msra.mxu1 %v539_v23 }
  0x20   :  { %502 = vmatprep.subr.bf16.mxu0 %v548_v0 }
  0x22   :  { %479 = vmatmul.mubr.bf16.vlgmr.msra.gmra.mxu0 %v399_v20 }
  0x23   :  { %518 = vmatprep.mubr.msk.bf16.mxu0 %vm549_vm0, %v548_v0  ;;  %503 = vmatpush3.bf16.msra.mxu0 %v540_v24 }
  0x24   :  { %504 = vmatprep.subr.bf16.mxu0 %v548_v0 }
  0x27   :  { %505 = vmatpush3.bf16.msra.mxu0 %v541_v25 }
  0x28   :  { %506 = vmatprep.subr.bf16.mxu0 %v548_v0 }
  0x2b   :  { %507 = vmatpush3.bf16.msra.mxu0 %v542_v26 }
  0x2c   :  { %508 = vmatprep.subr.bf16.mxu0 %v548_v0 }
  0x2f   :  { %509 = vmatpush3.bf16.msra.mxu0 %v543_v27 }
  0x30   :  { %510 = vmatprep.subr.bf16.mxu0 %v548_v0 }
  0x33   :  { %511 = vmatpush3.bf16.msra.mxu0 %v544_v28 }
  0x34   :  { %512 = vmatprep.subr.bf16.mxu0 %v548_v0 }
  0x37   :  { %513 = vmatpush3.bf16.msra.mxu0 %v545_v39 }
  0x38   :  { %514 = vmatprep.subr.bf16.mxu0 %v548_v0 }
  0x3b   :  { %515 = vmatpush3.bf16.msra.mxu0 %v546_v40 }
  0x3c   :  { %516 = vmatprep.subr.bf16.mxu0 %v548_v0 }
  0x3f   :  { %517 = vmatpush3.bf16.msra.mxu0 %v547_v41 }
  0xe2   :  { %v147_v30 = vpop.f32.mrf.mxu0 }
  0xe3   :  { %v148_v32 = vadd.f32 %v398_v29, %v147_v30 }
  0xe4   :  { %v480_v31 = vpop.f32.mrf.mxu0 }
  0xe5   :  { %v154_v36 = vmax.f32 %v148_v32, 0.0 }
  0xe6   :  { %v150_v33 = vpop.f32.mrf.mxu0 }
  0xe7   :  { %v151_v34 = vadd.f32 %v398_v29, %v150_v33 }
  0xe8   :  { %v481_v35 = vpop.f32.mrf.mxu0 }
  0xe9   :  { %v155_v37 = vmax.f32 %v151_v34, 0.0 }
  0xeb   :  { %v156_v38 = vpack.c.bf16 %v155_v37, %v154_v36 }
  0xed   :  { %499 = vmatmul.mubr.bf16.vlgmr.msra.gmra.mxu1 %v156_v38 }
 0x1ad   :  { %v262_v43 = vpop.f32.mrf.mxu1 }
 0x1ae   :  { %v263_v45 = vadd.f32 %v408_v42, %v262_v43 }
 0x1af   :  { %v500_v44 = vpop.f32.mrf.mxu1 }
 0x1b0   :  { %v269_v49 = vmax.f32 %v263_v45, 0.0 }
 0x1b1   :  { %v265_v46 = vpop.f32.mrf.mxu1 }
 0x1b2   :  { %v266_v47 = vadd.f32 %v408_v42, %v265_v46 }
 0x1b3   :  { %v501_v48 = vpop.f32.mrf.mxu1 }
 0x1b4   :  { %v270_v50 = vmax.f32 %v266_v47, 0.0 }
 0x1b6   :  { %v271_v51 = vpack.c.bf16 %v270_v50, %v269_v49 }
 0x1b8   :  { %519 = vmatmul.mubr.bf16.vlgmr.msra.gmra.mxu0 %v271_v51 }
 0x278   :  { %v377_v52 = vpop.f32.mrf.mxu0 }
 0x279   :  { %v378_v56 = vadd.f32 %v417_v53, %v377_v52 }
 0x27a   :  { %v520_v54 = vpop.f32.mrf.mxu0 }
 0x27c   :  { %v380_v55 = vpop.f32.mrf.mxu0 }
 0x27d   :  { %v381_v57 = vadd.f32 %v417_v53, %v380_v55 }
 0x27e   :  { %v521_v58 = vpop.f32.mrf.mxu0 }
 0x27f   :  { %v433_v59 = vpack.c.bf16 %v381_v57, %v378_v56 }
 0x281   :  { %434 = vst [vmem:[%s729_s8] sm:$0xff] %v433_v59  }

// kernel: gcn_model_forward.4
= control target key start
LH: loop header
LB: loop body
LE: loop exit
PB: predicated region body
PF: predicated region fallthrough
CT: control target
= control target key end

     0   :  { %s2933_s15 = smov 0   ;;  %s2935_s16 = smov 0   ;;  %s3334_s0 = inlined_call_operand.vmem [shape: bf16[512,512], index: 0, kind: input, shape index: {}]   ;;  %s3335_s1 = inlined_call_operand.vmem [shape: bf16[512,128], index: 1, kind: input, shape index: {}]   ;;  %s3336_s2 = inlined_call_operand.vmem [shape: bf16[128,128], index: 2, kind: input, shape index: {}]   ;;  %s3337_s3 = inlined_call_operand.vmem [shape: f32[1,128], index: 3, kind: input, shape index: {}]   ;;  %s3338_s4 = inlined_call_operand.vmem [shape: bf16[512,128], index: 4, kind: output, shape index: {}]  }
   0x1   :  { %s2937_s17 = smov 0  }
   0x2 LB: > { %s26_s18 = sadd.s32 1, %s2902_s16  ;;  %p2091_p0 = scmp.ge.s32.totalorder %s2906_s17, 1  ;;  %s2906_s17 = sphi %s2937_s17, %s14_s17   ;;  %s2902_s16 = sphi %s2935_s16, %s3376_s16   ;;  %s2898_s15 = sphi %s2933_s15, %s3375_s15  }
   0x3   : > { %p28_p1 = scmp.ge.s32.totalorder %s26_s18, 2  ;;  %p194_p2 = scmp.lt.s32.totalorder %s2906_s17, 3 }
   0x5   : > { %s3378_s18 = smov (%p28_p1, %s26_s18), 0  ;;  %p195_p3 = pnand %p2091_p0, %p194_p2 }
   0x7   : > { %198 = sbr.rel (%p195_p3) target bundleno = 662 (0x296), region = 36 }
   0xc   : > { %v2748_v0 = vld [vmem:[%s3336_s2 + $0x38] sm:$0xff]   ;;  %v2749_v1 = vld [vmem:[%s3336_s2 + $0x30] sm:$0xff]   ;;  %v2750_v2 = vld [vmem:[%s3336_s2 + $0x28] sm:$0xff]   ;;  %s2092_s7 = sshll.u32 %s2898_s15, 5 }
   0xd   : > { %2628 = vmatprep.subr.bf16.mxu0 %v2748_v0  ;;  %2708 = vmatprep.subr.bf16.mxu1 %v2748_v0  ;;  %v2751_v3 = vld [vmem:[%s3336_s2 + $0x20] sm:$0xff]   ;;  %v2752_v6 = vld [vmem:[%s3336_s2 + $0x18] sm:$0xff]   ;;  %v2753_v7 = vld [vmem:[%s3336_s2 + $0x10] sm:$0xff]   ;;  %p232_p4 = scmp.lt.s32.totalorder %s2092_s7, 63 }
   0xe   : > { %2629 = vmatpush3.bf16.msra.mxu0 %v2748_v0  ;;  %2716 = vmatpush3.bf16.msra.mxu1 %v2748_v0  ;;  %v2756_v4 = vld [vmem:[%s3335_s1] sm:$0xff]   ;;  %v2754_v8 = vld [vmem:[%s3336_s2 + $0x8] sm:$0xff]   ;;  %v2760_v12 = vld [vmem:[%s3335_s1 + $0x10] sm:$0xff]  }
   0xf   : > { %2630 = vmatprep.subr.bf16.mxu0 %v2749_v1  ;;  %2709 = vmatprep.subr.bf16.mxu1 %v2749_v1  ;;  %v2757_v5 = vld [vmem:[%s3335_s1 + $0x80] sm:$0xff]   ;;  %v2758_v10 = vld [vmem:[%s3335_s1 + $0x8] sm:$0xff]   ;;  %v2761_v13 = vld [vmem:[%s3335_s1 + $0x90] sm:$0xff]   ;;  %s3380_s7 = smov (!%p232_p4, %s2092_s7), 63 }
  0x10   : > { %2644 = vmatprep.mubr.bf16.mxu0 %v2756_v4  ;;  %2676 = vmatprep.mubr.bf16.mxu1 %v2757_v5  ;;  %v2755_v9 = vld [vmem:[%s3336_s2] sm:$0xff]   ;;  %v2759_v11 = vld [vmem:[%s3335_s1 + $0x88] sm:$0xff]   ;;  %v2762_v14 = vld [vmem:[%s3335_s1 + $0x18] sm:$0xff]   ;;  %s2236_s8 = sshll.u32 %s3380_s7, 4  ;;  %s2096_s13 = sshll.u32 %s3380_s7, 2 }
  0x11   : > { %v2763_v15 = vld [vmem:[%s3335_s1 + $0x98] sm:$0xff]   ;;  %v2764_v16 = vld [vmem:[%s3335_s1 + $0x20] sm:$0xff]   ;;  %v2766_v18 = vld [vmem:[%s3335_s1 + $0x28] sm:$0xff]   ;;  %s3080_s11 = scalar_lea.vmem %s3334_s0, %s2236_s8  ;;  %s3277_s20 = scalar_lea.vmem %s3338_s4, %s2096_s13 }
  0x12   : > { %2631 = vmatpush3.bf16.msra.mxu0 %v2749_v1  ;;  %2717 = vmatpush3.bf16.msra.mxu1 %v2749_v1  ;;  %v2765_v17 = vld [vmem:[%s3335_s1 + $0xa0] sm:$0xff]   ;;  %v2767_v19 = vld [vmem:[%s3335_s1 + $0xa8] sm:$0xff]   ;;  %v2768_v20 = vld [vmem:[%s3335_s1 + $0x30] sm:$0xff]  }
  0x13   : > { %2632 = vmatprep.subr.bf16.mxu0 %v2750_v2  ;;  %2710 = vmatprep.subr.bf16.mxu1 %v2750_v2  ;;  %v2769_v21 = vld [vmem:[%s3335_s1 + $0xb0] sm:$0xff]   ;;  %v2770_v22 = vld [vmem:[%s3335_s1 + $0x38] sm:$0xff]   ;;  %v2772_v24 = vld [vmem:[%s3335_s1 + $0x40] sm:$0xff]  }
  0x14   : > { %v2771_v23 = vld [vmem:[%s3335_s1 + $0xb8] sm:$0xff]   ;;  %v2773_v25 = vld [vmem:[%s3335_s1 + $0xc0] sm:$0xff]   ;;  %v2774_v26 = vld [vmem:[%s3335_s1 + $0x48] sm:$0xff]  }
  0x15   : > { %v2775_v27 = vld [vmem:[%s3335_s1 + $0xc8] sm:$0xff]   ;;  %v2776_v28 = vld [vmem:[%s3335_s1 + $0x50] sm:$0xff]   ;;  %v2778_v30 = vld [vmem:[%s3335_s1 + $0x58] sm:$0xff]  }
  0x16   : > { %2633 = vmatpush3.bf16.msra.mxu0 %v2750_v2  ;;  %2718 = vmatpush3.bf16.msra.mxu1 %v2750_v2  ;;  %v2777_v29 = vld [vmem:[%s3335_s1 + $0xd0] sm:$0xff]   ;;  %v2779_v31 = vld [vmem:[%s3335_s1 + $0xd8] sm:$0xff]   ;;  %v2780_v32 = vld [vmem:[%s3335_s1 + $0x60] sm:$0xff]  }
  0x17   : > { %2634 = vmatprep.subr.bf16.mxu0 %v2751_v3  ;;  %2711 = vmatprep.subr.bf16.mxu1 %v2751_v3  ;;  %v2781_v33 = vld [vmem:[%s3335_s1 + $0xe0] sm:$0xff]   ;;  %v2782_v34 = vld [vmem:[%s3335_s1 + $0x68] sm:$0xff]   ;;  %v2784_v36 = vld [vmem:[%s3335_s1 + $0x70] sm:$0xff]  }
  0x18   : > { %v2783_v35 = vld [vmem:[%s3335_s1 + $0xe8] sm:$0xff]   ;;  %v2785_v37 = vld [vmem:[%s3335_s1 + $0xf0] sm:$0xff]   ;;  %v2786_v38 = vld [vmem:[%s3335_s1 + $0x78] sm:$0xff]  }
  0x19   : > { %v2787_v39 = vld [vmem:[%s3335_s1 + $0xf8] sm:$0xff]   ;;  %v2790_v40 = vld [vmem:[%s3080_s11 + $0x4] ss:$16 sps:$4 sm:$0xff]  }
  0x1a   : > { %2635 = vmatpush3.bf16.msra.mxu0 %v2751_v3  ;;  %2719 = vmatpush3.bf16.msra.mxu1 %v2751_v3  ;;  %v2793_v41 = vld [vmem:[%s3080_s11 + $0xc] ss:$16 sps:$4 sm:$0xff]  }
  0x1b   : > { %2636 = vmatprep.subr.bf16.mxu0 %v2752_v6  ;;  %2712 = vmatprep.subr.bf16.mxu1 %v2752_v6 }
  0x1e   : > { %2637 = vmatpush3.bf16.msra.mxu0 %v2752_v6  ;;  %2720 = vmatpush3.bf16.msra.mxu1 %v2752_v6 }
  0x1f   : > { %2638 = vmatprep.subr.bf16.mxu0 %v2753_v7  ;;  %2713 = vmatprep.subr.bf16.mxu1 %v2753_v7 }
  0x22   : > { %2639 = vmatpush3.bf16.msra.mxu0 %v2753_v7  ;;  %2721 = vmatpush3.bf16.msra.mxu1 %v2753_v7 }
  0x23   : > { %2640 = vmatprep.subr.bf16.mxu0 %v2754_v8  ;;  %2714 = vmatprep.subr.bf16.mxu1 %v2754_v8 }
  0x26   : > { %2641 = vmatpush3.bf16.msra.mxu0 %v2754_v8  ;;  %2722 = vmatpush3.bf16.msra.mxu1 %v2754_v8 }
  0x27   : > { %2642 = vmatprep.subr.bf16.mxu0 %v2755_v9  ;;  %2715 = vmatprep.subr.bf16.mxu1 %v2755_v9 }
  0x2a   : > { %2643 = vmatpush3.bf16.msra.mxu0 %v2755_v9  ;;  %2723 = vmatpush3.bf16.msra.mxu1 %v2755_v9 }
  0x2d   : > { %2645 = vmatmul.mubr.bf16.vlgmr.msra.gmra.mxu0 %v2758_v10  ;;  %2677 = vmatmul.mubr.bf16.vlgmr.msra.gmra.mxu1 %v2759_v11 }
  0x2e   : > { %2648 = vmatprep.mubr.bf16.mxu0 %v2760_v12  ;;  %2680 = vmatprep.mubr.bf16.mxu1 %v2761_v13 }
  0x35   : > { %2649 = vmatmul.mubr.bf16.gmra.mxu0 %v2762_v14  ;;  %2681 = vmatmul.mubr.bf16.gmra.mxu1 %v2763_v15 }
  0x36   : > { %2652 = vmatprep.mubr.bf16.mxu0 %v2764_v16  ;;  %2684 = vmatprep.mubr.bf16.mxu1 %v2765_v17 }
  0x3d   : > { %2653 = vmatmul.mubr.bf16.gmra.mxu0 %v2766_v18  ;;  %2685 = vmatmul.mubr.bf16.gmra.mxu1 %v2767_v19 }
  0x3e   : > { %2656 = vmatprep.mubr.bf16.mxu0 %v2768_v20  ;;  %2688 = vmatprep.mubr.bf16.mxu1 %v2769_v21 }
  0x45   : > { %2657 = vmatmul.mubr.bf16.gmra.mxu0 %v2770_v22  ;;  %2689 = vmatmul.mubr.bf16.gmra.mxu1 %v2771_v23 }
  0x46   : > { %2660 = vmatprep.mubr.bf16.mxu0 %v2772_v24  ;;  %2692 = vmatprep.mubr.bf16.mxu1 %v2773_v25 }
  0x4d   : > { %2661 = vmatmul.mubr.bf16.gmra.mxu0 %v2774_v26  ;;  %2693 = vmatmul.mubr.bf16.gmra.mxu1 %v2775_v27 }
  0x4e   : > { %2664 = vmatprep.mubr.bf16.mxu0 %v2776_v28  ;;  %2696 = vmatprep.mubr.bf16.mxu1 %v2777_v29 }
  0x55   : > { %2665 = vmatmul.mubr.bf16.gmra.mxu0 %v2778_v30  ;;  %2697 = vmatmul.mubr.bf16.gmra.mxu1 %v2779_v31 }
  0x56   : > { %2668 = vmatprep.mubr.bf16.mxu0 %v2780_v32  ;;  %2700 = vmatprep.mubr.bf16.mxu1 %v2781_v33 }
  0x5d   : > { %2669 = vmatmul.mubr.bf16.gmra.mxu0 %v2782_v34  ;;  %2701 = vmatmul.mubr.bf16.gmra.mxu1 %v2783_v35 }
  0x5e   : > { %2672 = vmatprep.mubr.bf16.mxu0 %v2784_v36  ;;  %2704 = vmatprep.mubr.bf16.mxu1 %v2785_v37 }
  0x65   : > { %2673 = vmatmul.mubr.bf16.gmra.mxu0 %v2786_v38  ;;  %2705 = vmatmul.mubr.bf16.gmra.mxu1 %v2787_v39 }
  0x66   : > { %1380 = vmatprep.mubr.bf16.mxu1 %v2790_v40  ;;  %1541 = vmatprep.mubr.bf16.mxu0 %v2793_v41 }
  0xed   : > { %v3084_v42 = vpop.f32.mrf.mxu0  ;;  %v3086_v43 = vpop.f32.mrf.mxu1 }
  0xee   : > { %3347 = vst [vmem:[#allocation3_spill] sm:$0xff] %v3084_v42  ;;  %3348 = vst [vmem:[#allocation4_spill] sm:$0xff] %v3086_v43 }
  0xef   : > { %v3088_v44 = vpop.f32.mrf.mxu0  ;;  %v3090_v45 = vpop.f32.mrf.mxu1 }
  0xf0   : > { %3349 = vst [vmem:[#allocation5_spill] sm:$0xff] %v3088_v44  ;;  %3350 = vst [vmem:[#allocation6_spill] sm:$0xff] %v3090_v45 }
  0xf1   : > { %v3092_v46 = vpop.f32.mrf.mxu0  ;;  %v3094_v47 = vpop.f32.mrf.mxu1 }
  0xf2   : > { %3351 = vst [vmem:[#allocation7_spill] sm:$0xff] %v3092_v46  ;;  %3352 = vst [vmem:[#allocation8_spill] sm:$0xff] %v3094_v47 }
  0xf3   : > { %v3100_v50 = vpop.f32.mrf.mxu0  ;;  %v3102_v51 = vpop.f32.mrf.mxu1 }
  0xf4   : > { %3353 = vst [vmem:[#allocation9_spill] sm:$0xff] %v3100_v50  ;;  %3354 = vst [vmem:[#allocation10_spill] sm:$0xff] %v3102_v51 }
  0xf5   : > { %v3108_v54 = vpop.f32.mrf.mxu0  ;;  %v3110_v55 = vpop.f32.mrf.mxu1 }
  0xf7   : > { %v3112_v56 = vpop.f32.mrf.mxu0  ;;  %v3114_v57 = vpop.f32.mrf.mxu1 }
  0xf9   : > { %v3116_v58 = vpop.f32.mrf.mxu0  ;;  %v3118_v59 = vpop.f32.mrf.mxu1 }
  0xfb   : > { %v3124_v62 = vpop.f32.mrf.mxu0  ;;  %v3126_v63 = vpop.f32.mrf.mxu1 }
  0xfd   : > { %v3132_v2 = vpop.f32.mrf.mxu0  ;;  %v3134_v3 = vpop.f32.mrf.mxu1 }
  0xff   : > { %v3136_v4 = vpop.f32.mrf.mxu0  ;;  %v3138_v5 = vpop.f32.mrf.mxu1 }
 0x101   : > { %v3140_v6 = vpop.f32.mrf.mxu0  ;;  %v3142_v7 = vpop.f32.mrf.mxu1 }
 0x103   : > { %v3144_v8 = vpop.f32.mrf.mxu0  ;;  %v3146_v9 = vpop.f32.mrf.mxu1 }
 0x105   : > { %v2658_v10 = vpop.f32.mrf.mxu0  ;;  %v2690_v11 = vpop.f32.mrf.mxu1 }
 0x107   : > { %v693_v12 = vpop.f32.mrf.mxu0  ;;  %v821_v13 = vpop.f32.mrf.mxu1 }
 0x109   : > { %v2659_v14 = vpop.f32.mrf.mxu0  ;;  %v2691_v15 = vpop.f32.mrf.mxu1 }
 0x10a   : > { %v1003_v45 = vpack.c.bf16 %v2659_v14, %v2658_v10  ;;  %v1019_v51 = vpack.c.bf16 %v2691_v15, %v2690_v11  ;;  %v3373_v10 = vld [vmem:[#allocation6_spill] sm:$0xff]  ;;  %v2798_v14 = vld [vmem:[%s3080_s11 + $0x20] ss:$16 sps:$4 sm:$0xff]  }
 0x10b   : > { %v696_v16 = vpop.f32.mrf.mxu0  ;;  %v824_v17 = vpop.f32.mrf.mxu1  ;;  %v2799_v15 = vld [vmem:[%s3080_s11 + $0x28] ss:$16 sps:$4 sm:$0xff]  }
 0x10c   : > { %v1002_v42 = vpack.c.bf16 %v696_v16, %v693_v12  ;;  %v1018_v46 = vpack.c.bf16 %v824_v17, %v821_v13  ;;  %v2794_v12 = vld [vmem:[%s3080_s11 + $0x24] ss:$16 sps:$4 sm:$0xff]   ;;  %v2796_v13 = vld [vmem:[%s3080_s11 + $0x2c] ss:$16 sps:$4 sm:$0xff]  }
 0x10d   : > { %v3148_v18 = vpop.f32.mrf.mxu0  ;;  %v3150_v19 = vpop.f32.mrf.mxu1  ;;  %v2800_v16 = vld [vmem:[%s3080_s11 + $0x44] ss:$16 sps:$4 sm:$0xff]   ;;  %v2802_v17 = vld [vmem:[%s3080_s11 + $0x4c] ss:$16 sps:$4 sm:$0xff]  }
 0x10f   : > { %v3152_v20 = vpop.f32.mrf.mxu0  ;;  %v3154_v21 = vpop.f32.mrf.mxu1 }
 0x110   : > { %3355 = vst [vmem:[#allocation11_spill] sm:$0xff] %v3154_v21 }
 0x111   : > { %v3156_v22 = vpop.f32.mrf.mxu0  ;;  %v3158_v23 = vpop.f32.mrf.mxu1 }
 0x113   : > { %v3160_v24 = vpop.f32.mrf.mxu0  ;;  %v3162_v25 = vpop.f32.mrf.mxu1 }
 0x114   : > { %3356 = vst [vmem:[#allocation12_spill] sm:$0xff] %v3162_v25 }
 0x115   : > { %v2666_v26 = vpop.f32.mrf.mxu0  ;;  %v2698_v27 = vpop.f32.mrf.mxu1 }
 0x117   : > { %v725_v28 = vpop.f32.mrf.mxu0  ;;  %v853_v29 = vpop.f32.mrf.mxu1 }
 0x119   : > { %v2667_v30 = vpop.f32.mrf.mxu0  ;;  %v2699_v31 = vpop.f32.mrf.mxu1 }
 0x11b   : > { %v728_v32 = vpop.f32.mrf.mxu0  ;;  %v856_v33 = vpop.f32.mrf.mxu1 }
 0x11d   : > { %v2670_v34 = vpop.f32.mrf.mxu0  ;;  %v2702_v35 = vpop.f32.mrf.mxu1 }
 0x11f   : > { %v741_v36 = vpop.f32.mrf.mxu0  ;;  %v869_v37 = vpop.f32.mrf.mxu1 }
 0x121   : > { %v2671_v38 = vpop.f32.mrf.mxu0  ;;  %v2703_v39 = vpop.f32.mrf.mxu1 }
 0x122   : > { %v1009_v25 = vpack.c.bf16 %v2671_v38, %v2670_v34  ;;  %v1025_v21 = vpack.c.bf16 %v2703_v39, %v2702_v35  ;;  %v2828_v34 = vld [vmem:[%s3080_s11 + $0xc0] ss:$16 sps:$4 sm:$0xff]   ;;  %v2829_v35 = vld [vmem:[%s3080_s11 + $0xc8] ss:$16 sps:$4 sm:$0xff]  }
 0x123   : > { %v744_v40 = vpop.f32.mrf.mxu0  ;;  %v872_v41 = vpop.f32.mrf.mxu1  ;;  %v2834_v38 = vld [vmem:[%s3080_s11 + $0xe0] ss:$16 sps:$4 sm:$0xff]   ;;  %v2835_v39 = vld [vmem:[%s3080_s11 + $0xe8] ss:$16 sps:$4 sm:$0xff]  }
 0x125   : > { %v2674_v53 = vpop.f32.mrf.mxu0  ;;  %v2706_v52 = vpop.f32.mrf.mxu1 }
 0x127   : > { %v757_v49 = vpop.f32.mrf.mxu0  ;;  %v885_v48 = vpop.f32.mrf.mxu1 }
 0x129   : > { %v2675_v1 = vpop.f32.mrf.mxu0  ;;  %v2707_v0 = vpop.f32.mrf.mxu1 }
 0x12a   : > { %v1011_v61 = vpack.c.bf16 %v2675_v1, %v2674_v53  ;;  %v1027_v60 = vpack.c.bf16 %v2707_v0, %v2706_v52  ;;  %v1001_v52 = vpack.c.bf16 %v3140_v6, %v3132_v2  ;;  %v3358_v53 = vpack.c.bf16 %v3118_v59, %v3110_v55  ;;  %v3362_v59 = vld [vmem:[#allocation12_spill] sm:$0xff]  ;;  %v3363_v2 = vld [vmem:[#allocation7_spill] sm:$0xff]  ;;  %v3369_v6 = vld [vmem:[#allocation9_spill] sm:$0xff] }
 0x12b   : > { %v760_v44 = vpop.f32.mrf.mxu0  ;;  %v888_v50 = vpop.f32.mrf.mxu1  ;;  %v3359_v0 = vpack.c.bf16 %v3124_v62, %v3112_v56  ;;  %v1004_v55 = vpack.c.bf16 %v3160_v24, %v3152_v20  ;;  %v3366_v56 = vld [vmem:[#allocation8_spill] sm:$0xff]  ;;  %v2806_v20 = vld [vmem:[%s3080_s11 + $0x64] ss:$16 sps:$4 sm:$0xff]  }
 0x12c   : > { %v1010_v43 = vpack.c.bf16 %v760_v44, %v757_v49  ;;  %v1026_v47 = vpack.c.bf16 %v888_v50, %v885_v48  ;;  %2404 = vmatprep.subr.bf16.mxu1 %v1011_v61  ;;  %2516 = vmatprep.subr.bf16.mxu0 %v1027_v60  ;;  %v1017_v44 = vpack.c.bf16 %v3142_v7, %v3134_v3  ;;  %v3364_v3 = vld [vmem:[#allocation3_spill] sm:$0xff]  ;;  %v3367_v62 = vld [vmem:[#allocation4_spill] sm:$0xff]  ;;  %v3370_v7 = vld [vmem:[#allocation5_spill] sm:$0xff] }
 0x12d   : > { %2405 = vmatpush3.bf16.msra.mxu1 %v1003_v45  ;;  %2517 = vmatpush3.bf16.msra.mxu0 %v1019_v51  ;;  %v1008_v48 = vpack.c.bf16 %v744_v40, %v741_v36  ;;  %v1024_v49 = vpack.c.bf16 %v872_v41, %v869_v37  ;;  %v1007_v45 = vpack.c.bf16 %v2667_v30, %v2666_v26  ;;  %v2812_v24 = vld [vmem:[%s3080_s11 + $0x84] ss:$16 sps:$4 sm:$0xff]   ;;  %v2816_v26 = vld [vmem:[%s3080_s11 + $0x80] ss:$16 sps:$4 sm:$0xff]   ;;  %v2832_v37 = vld [vmem:[%s3080_s11 + $0xec] ss:$16 sps:$4 sm:$0xff]  }
 0x12e   : > { %2406 = vmatprep.subr.bf16.mxu1 %v1010_v43  ;;  %2518 = vmatprep.subr.bf16.mxu0 %v1026_v47  ;;  %v1000_v43 = vpack.c.bf16 %v3144_v8, %v3136_v4  ;;  %v1006_v47 = vpack.c.bf16 %v728_v32, %v725_v28  ;;  %v1022_v50 = vpack.c.bf16 %v856_v33, %v853_v29  ;;  %v2818_v28 = vld [vmem:[%s3080_s11 + $0xa4] ss:$16 sps:$4 sm:$0xff]   ;;  %v2820_v29 = vld [vmem:[%s3080_s11 + $0xac] ss:$16 sps:$4 sm:$0xff]   ;;  %v2822_v30 = vld [vmem:[%s3080_s11 + $0xa0] ss:$16 sps:$4 sm:$0xff]  }
 0x12f   : > { %v3357_v51 = vpack.c.bf16 %v3116_v58, %v3108_v54  ;;  %v1005_v60 = vpack.c.bf16 %v3156_v22, %v3148_v18  ;;  %v1021_v61 = vpack.c.bf16 %v3158_v23, %v3150_v19  ;;  %v3360_v54 = vpack.c.bf16 %v3126_v63, %v3114_v57  ;;  %v3361_v58 = vld [vmem:[#allocation11_spill] sm:$0xff]  ;;  %v2791_v63 = vld [vmem:[%s3080_s11 + $0x8] ss:$16 sps:$4 sm:$0xff]   ;;  %v2826_v33 = vld [vmem:[%s3080_s11 + $0xcc] ss:$16 sps:$4 sm:$0xff]  }
 0x130   : > { %v1020_v1 = vpack.c.bf16 %v3362_v59, %v3361_v58  ;;  %v3365_v4 = vpack.c.bf16 %v3363_v2, %v3364_v3  ;;  %v2788_v57 = vld [vmem:[%s3080_s11] ss:$16 sps:$4 sm:$0xff]   ;;  %v3371_v8 = vpack.c.bf16 %v3369_v6, %v3370_v7  ;;  %v2805_v19 = vld [vmem:[%s3080_s11 + $0x48] ss:$16 sps:$4 sm:$0xff]   ;;  %v2824_v32 = vld [vmem:[%s3080_s11 + $0xc4] ss:$16 sps:$4 sm:$0xff]  }
 0x131   : > { %2407 = vmatpush3.bf16.msra.mxu1 %v1002_v42  ;;  %2519 = vmatpush3.bf16.msra.mxu0 %v1018_v46  ;;  %v1016_v42 = vpack.c.bf16 %v3146_v9, %v3138_v5  ;;  %v1023_v46 = vpack.c.bf16 %v2699_v31, %v2698_v27  ;;  %v3368_v5 = vpack.c.bf16 %v3366_v56, %v3367_v62  ;;  %v3372_v9 = vld [vmem:[#allocation10_spill] sm:$0xff]  ;;  %v2804_v18 = vld [vmem:[%s3080_s11 + $0x40] ss:$16 sps:$4 sm:$0xff]   ;;  %v2830_v36 = vld [vmem:[%s3080_s11 + $0xe4] ss:$16 sps:$4 sm:$0xff]  }
 0x132   : > { %2408 = vmatprep.subr.bf16.mxu1 %v1009_v25  ;;  %2520 = vmatprep.subr.bf16.mxu0 %v1025_v21  ;;  %v3374_v11 = vpack.c.bf16 %v3372_v9, %v3373_v10  ;;  %v2808_v21 = vld [vmem:[%s3080_s11 + $0x6c] ss:$16 sps:$4 sm:$0xff]   ;;  %v2810_v22 = vld [vmem:[%s3080_s11 + $0x60] ss:$16 sps:$4 sm:$0xff]   ;;  %v2811_v23 = vld [vmem:[%s3080_s11 + $0x68] ss:$16 sps:$4 sm:$0xff]  }
 0x133   : > { %v2814_v25 = vld [vmem:[%s3080_s11 + $0x8c] ss:$16 sps:$4 sm:$0xff]   ;;  %v2817_v27 = vld [vmem:[%s3080_s11 + $0x88] ss:$16 sps:$4 sm:$0xff]   ;;  %v2836_v40 = vld [vmem:[%s3080_s11 + $0x104] ss:$16 sps:$4 sm:$0xff]  }
 0x134   : > { %v2823_v31 = vld [vmem:[%s3080_s11 + $0xa8] ss:$16 sps:$4 sm:$0xff]   ;;  %v2838_v41 = vld [vmem:[%s3080_s11 + $0x10c] ss:$16 sps:$4 sm:$0xff]   ;;  %v2866_v59 = vld [vmem:[%s3080_s11 + $0x1a4] ss:$16 sps:$4 sm:$0xff]  }
 0x135   : > { %2409 = vmatpush3.bf16.msra.mxu1 %v1001_v52  ;;  %2521 = vmatpush3.bf16.msra.mxu0 %v1017_v44  ;;  %v2840_v52 = vld [vmem:[%s3080_s11 + $0x100] ss:$16 sps:$4 sm:$0xff]   ;;  %v2841_v44 = vld [vmem:[%s3080_s11 + $0x108] ss:$16 sps:$4 sm:$0xff]   ;;  %v2874_v56 = vld [vmem:[%s3080_s11 + $0x1cc] ss:$16 sps:$4 sm:$0xff]  }
 0x136   : > { %2410 = vmatprep.subr.bf16.mxu1 %v1008_v48  ;;  %2522 = vmatprep.subr.bf16.mxu0 %v1024_v49  ;;  %v2842_v48 = vld [vmem:[%s3080_s11 + $0x124] ss:$16 sps:$4 sm:$0xff]   ;;  %v2844_v49 = vld [vmem:[%s3080_s11 + $0x12c] ss:$16 sps:$4 sm:$0xff]   ;;  %v2865_v58 = vld [vmem:[%s3080_s11 + $0x188] ss:$16 sps:$4 sm:$0xff]  }
 0x137   : > { %v2870_v2 = vld [vmem:[%s3080_s11 + $0x1a0] ss:$16 sps:$4 sm:$0xff]   ;;  %v2871_v3 = vld [vmem:[%s3080_s11 + $0x1a8] ss:$16 sps:$4 sm:$0xff]  }
 0x138   : > { %v2876_v62 = vld [vmem:[%s3080_s11 + $0x1c0] ss:$16 sps:$4 sm:$0xff]   ;;  %v2883_v7 = vld [vmem:[%s3080_s11 + $0x1e8] ss:$16 sps:$4 sm:$0xff]  }
 0x139   : > { %2411 = vmatpush3.bf16.msra.mxu1 %v1000_v43  ;;  %2523 = vmatpush3.bf16.msra.mxu0 %v1016_v42  ;;  %v2846_v43 = vld [vmem:[%s3080_s11 + $0x120] ss:$16 sps:$4 sm:$0xff]   ;;  %v2847_v42 = vld [vmem:[%s3080_s11 + $0x128] ss:$16 sps:$4 sm:$0xff]  }
 0x13a   : > { %2412 = vmatprep.subr.bf16.mxu1 %v1007_v45  ;;  %2524 = vmatprep.subr.bf16.mxu0 %v1023_v46  ;;  %v2848_v45 = vld [vmem:[%s3080_s11 + $0x144] ss:$16 sps:$4 sm:$0xff]   ;;  %v2850_v46 = vld [vmem:[%s3080_s11 + $0x14c] ss:$16 sps:$4 sm:$0xff]   ;;  %v2882_v6 = vld [vmem:[%s3080_s11 + $0x1e0] ss:$16 sps:$4 sm:$0xff]  }
 0x13d   : > { %2413 = vmatpush3.bf16.msra.mxu1 %v3357_v51  ;;  %2525 = vmatpush3.bf16.msra.mxu0 %v3358_v53  ;;  %v2854_v51 = vld [vmem:[%s3080_s11 + $0x164] ss:$16 sps:$4 sm:$0xff]   ;;  %v2856_v53 = vld [vmem:[%s3080_s11 + $0x16c] ss:$16 sps:$4 sm:$0xff]  }
 0x13e   : > { %2414 = vmatprep.subr.bf16.mxu1 %v1006_v47  ;;  %2526 = vmatprep.subr.bf16.mxu0 %v1022_v50  ;;  %v2852_v47 = vld [vmem:[%s3080_s11 + $0x140] ss:$16 sps:$4 sm:$0xff]   ;;  %v2853_v50 = vld [vmem:[%s3080_s11 + $0x148] ss:$16 sps:$4 sm:$0xff]  }
 0x141   : > { %2415 = vmatpush3.bf16.msra.mxu1 %v3359_v0  ;;  %2527 = vmatpush3.bf16.msra.mxu0 %v3360_v54  ;;  %v2860_v0 = vld [vmem:[%s3080_s11 + $0x184] ss:$16 sps:$4 sm:$0xff]   ;;  %v2862_v54 = vld [vmem:[%s3080_s11 + $0x18c] ss:$16 sps:$4 sm:$0xff]  }
 0x142   : > { %2416 = vmatprep.subr.bf16.mxu1 %v1005_v60  ;;  %2528 = vmatprep.subr.bf16.mxu0 %v1021_v61  ;;  %v2858_v60 = vld [vmem:[%s3080_s11 + $0x160] ss:$16 sps:$4 sm:$0xff]   ;;  %v2859_v61 = vld [vmem:[%s3080_s11 + $0x168] ss:$16 sps:$4 sm:$0xff]  }
 0x145   : > { %2417 = vmatpush3.bf16.msra.mxu1 %v3365_v4  ;;  %2529 = vmatpush3.bf16.msra.mxu0 %v3368_v5  ;;  %v2872_v4 = vld [vmem:[%s3080_s11 + $0x1c4] ss:$16 sps:$4 sm:$0xff]   ;;  %v2877_v5 = vld [vmem:[%s3080_s11 + $0x1c8] ss:$16 sps:$4 sm:$0xff]  }
 0x146   : > { %2418 = vmatprep.subr.bf16.mxu1 %v1004_v55  ;;  %2530 = vmatprep.subr.bf16.mxu0 %v1020_v1  ;;  %v2864_v55 = vld [vmem:[%s3080_s11 + $0x180] ss:$16 sps:$4 sm:$0xff]   ;;  %v2868_v1 = vld [vmem:[%s3080_s11 + $0x1ac] ss:$16 sps:$4 sm:$0xff]  }
 0x149   : > { %2419 = vmatpush3.bf16.msra.mxu1 %v3371_v8  ;;  %2531 = vmatpush3.bf16.msra.mxu0 %v3374_v11 }
 0x14c   : > { %1381 = vmatmul.mubr.bf16.vlgmr.msra.gmra.mxu1 %v2788_v57  ;;  %1542 = vmatmul.mubr.bf16.vlgmr.msra.gmra.mxu0 %v2791_v63  ;;  %v2878_v57 = vld [vmem:[%s3080_s11 + $0x1e4] ss:$16 sps:$4 sm:$0xff]   ;;  %v2880_v63 = vld [vmem:[%s3080_s11 + $0x1ec] ss:$16 sps:$4 sm:$0xff]  }
 0x14d   : > { %1388 = vmatprep.mubr.bf16.mxu1 %v2794_v12  ;;  %1549 = vmatprep.mubr.bf16.mxu0 %v2796_v13 }
 0x154   : > { %1389 = vmatmul.mubr.bf16.gmra.mxu1 %v2798_v14  ;;  %1550 = vmatmul.mubr.bf16.gmra.mxu0 %v2799_v15 }
 0x155   : > { %1396 = vmatprep.mubr.bf16.mxu1 %v2800_v16  ;;  %1557 = vmatprep.mubr.bf16.mxu0 %v2802_v17  ;;  %v3269_v17 = vld [vmem:[%s3337_s3] ss:$0 sm:$0xff] }
 0x15c   : > { %1397 = vmatmul.mubr.bf16.gmra.mxu1 %v2804_v18  ;;  %1558 = vmatmul.mubr.bf16.gmra.mxu0 %v2805_v19 }
 0x15d   : > { %1404 = vmatprep.mubr.bf16.mxu1 %v2806_v20  ;;  %1565 = vmatprep.mubr.bf16.mxu0 %v2808_v21 }
 0x164   : > { %1405 = vmatmul.mubr.bf16.gmra.mxu1 %v2810_v22  ;;  %1566 = vmatmul.mubr.bf16.gmra.mxu0 %v2811_v23 }
 0x165   : > { %1412 = vmatprep.mubr.bf16.mxu1 %v2812_v24  ;;  %1573 = vmatprep.mubr.bf16.mxu0 %v2814_v25 }
 0x16c   : > { %1413 = vmatmul.mubr.bf16.gmra.mxu1 %v2816_v26  ;;  %1574 = vmatmul.mubr.bf16.gmra.mxu0 %v2817_v27 }
 0x16d   : > { %1420 = vmatprep.mubr.bf16.mxu1 %v2818_v28  ;;  %1581 = vmatprep.mubr.bf16.mxu0 %v2820_v29 }
 0x174   : > { %1421 = vmatmul.mubr.bf16.gmra.mxu1 %v2822_v30  ;;  %1582 = vmatmul.mubr.bf16.gmra.mxu0 %v2823_v31 }
 0x175   : > { %1428 = vmatprep.mubr.bf16.mxu1 %v2824_v32  ;;  %1589 = vmatprep.mubr.bf16.mxu0 %v2826_v33 }
 0x17c   : > { %1429 = vmatmul.mubr.bf16.gmra.mxu1 %v2828_v34  ;;  %1590 = vmatmul.mubr.bf16.gmra.mxu0 %v2829_v35 }
 0x17d   : > { %1436 = vmatprep.mubr.bf16.mxu1 %v2830_v36  ;;  %1597 = vmatprep.mubr.bf16.mxu0 %v2832_v37 }
 0x184   : > { %1437 = vmatmul.mubr.bf16.gmra.mxu1 %v2834_v38  ;;  %1598 = vmatmul.mubr.bf16.gmra.mxu0 %v2835_v39 }
 0x185   : > { %1444 = vmatprep.mubr.bf16.mxu1 %v2836_v40  ;;  %1605 = vmatprep.mubr.bf16.mxu0 %v2838_v41 }
 0x18c   : > { %1445 = vmatmul.mubr.bf16.gmra.mxu1 %v2840_v52  ;;  %1606 = vmatmul.mubr.bf16.gmra.mxu0 %v2841_v44 }
 0x18d   : > { %1452 = vmatprep.mubr.bf16.mxu1 %v2842_v48  ;;  %1613 = vmatprep.mubr.bf16.mxu0 %v2844_v49 }
 0x194   : > { %1453 = vmatmul.mubr.bf16.gmra.mxu1 %v2846_v43  ;;  %1614 = vmatmul.mubr.bf16.gmra.mxu0 %v2847_v42 }
 0x195   : > { %1460 = vmatprep.mubr.bf16.mxu1 %v2848_v45  ;;  %1621 = vmatprep.mubr.bf16.mxu0 %v2850_v46 }
 0x19c   : > { %1461 = vmatmul.mubr.bf16.gmra.mxu1 %v2852_v47  ;;  %1622 = vmatmul.mubr.bf16.gmra.mxu0 %v2853_v50 }
 0x19d   : > { %1468 = vmatprep.mubr.bf16.mxu1 %v2854_v51  ;;  %1629 = vmatprep.mubr.bf16.mxu0 %v2856_v53 }
 0x1a4   : > { %1469 = vmatmul.mubr.bf16.gmra.mxu1 %v2858_v60  ;;  %1630 = vmatmul.mubr.bf16.gmra.mxu0 %v2859_v61 }
 0x1a5   : > { %1476 = vmatprep.mubr.bf16.mxu1 %v2860_v0  ;;  %1637 = vmatprep.mubr.bf16.mxu0 %v2862_v54 }
 0x1ac   : > { %1477 = vmatmul.mubr.bf16.gmra.mxu1 %v2864_v55  ;;  %1638 = vmatmul.mubr.bf16.gmra.mxu0 %v2865_v58 }
 0x1ad   : > { %1484 = vmatprep.mubr.bf16.mxu1 %v2866_v59  ;;  %1645 = vmatprep.mubr.bf16.mxu0 %v2868_v1 }
 0x1b4   : > { %1485 = vmatmul.mubr.bf16.gmra.mxu1 %v2870_v2  ;;  %1646 = vmatmul.mubr.bf16.gmra.mxu0 %v2871_v3 }
 0x1b5   : > { %1492 = vmatprep.mubr.bf16.mxu1 %v2872_v4  ;;  %1653 = vmatprep.mubr.bf16.mxu0 %v2874_v56 }
 0x1bc   : > { %1493 = vmatmul.mubr.bf16.gmra.mxu1 %v2876_v62  ;;  %1654 = vmatmul.mubr.bf16.gmra.mxu0 %v2877_v5 }
 0x1bd   : > { %1500 = vmatprep.mubr.bf16.mxu1 %v2878_v57  ;;  %1661 = vmatprep.mubr.bf16.mxu0 %v2880_v63 }
 0x1c4   : > { %1501 = vmatmul.mubr.bf16.gmra.mxu1 %v2882_v6  ;;  %1662 = vmatmul.mubr.bf16.gmra.mxu0 %v2883_v7 }
 0x20c   : > { %v2420_v8 = vpop.f32.mrf.mxu1  ;;  %v2532_v9 = vpop.f32.mrf.mxu0 }
 0x20e   : > { %v2421_v10 = vpop.f32.mrf.mxu1  ;;  %v2533_v11 = vpop.f32.mrf.mxu0 }
 0x20f   : > { %v2422_v12 = vadd.f32 %v2421_v10, %v2420_v8  ;;  %v2534_v13 = vadd.f32 %v2533_v11, %v2532_v9 }
 0x210   : > { %v2423_v14 = vpop.f32.mrf.mxu1  ;;  %v2535_v15 = vpop.f32.mrf.mxu0 }
 0x211   : > { %v1544_v16 = vadd.f32 %v2534_v13, %v2422_v12 }
 0x212   : > { %v2424_v18 = vpop.f32.mrf.mxu1  ;;  %v2536_v19 = vpop.f32.mrf.mxu0 }
 0x213   : > { %v2425_v20 = vadd.f32 %v2424_v18, %v2423_v14  ;;  %v2537_v21 = vadd.f32 %v2536_v19, %v2535_v15  ;;  %v1776_v24 = vadd.f32 %v3269_v17, %v1544_v16 }
 0x214   : > { %v2426_v22 = vpop.f32.mrf.mxu1  ;;  %v2538_v23 = vpop.f32.mrf.mxu0 }
 0x215   : > { %v1547_v25 = vadd.f32 %v2537_v21, %v2425_v20  ;;  %v1808_v33 = vmax.f32 %v1776_v24, 0.0 }
 0x216   : > { %v2427_v26 = vpop.f32.mrf.mxu1  ;;  %v2539_v27 = vpop.f32.mrf.mxu0 }
 0x217   : > { %v1777_v28 = vadd.f32 %v3269_v17, %v1547_v25  ;;  %v2428_v29 = vadd.f32 %v2427_v26, %v2426_v22  ;;  %v2540_v30 = vadd.f32 %v2539_v27, %v2538_v23 }
 0x218   : > { %v2429_v31 = vpop.f32.mrf.mxu1  ;;  %v2541_v32 = vpop.f32.mrf.mxu0 }
 0x219   : > { %v1809_v34 = vmax.f32 %v1777_v28, 0.0  ;;  %v1552_v35 = vadd.f32 %v2540_v30, %v2428_v29 }
 0x21a   : > { %v2430_v36 = vpop.f32.mrf.mxu1  ;;  %v2542_v37 = vpop.f32.mrf.mxu0 }
 0x21b   : > { %v2272_v38 = vpack.c.bf16 %v1809_v34, %v1808_v33  ;;  %v2431_v39 = vadd.f32 %v2430_v36, %v2429_v31  ;;  %v2543_v40 = vadd.f32 %v2542_v37, %v2541_v32  ;;  %v1778_v44 = vadd.f32 %v3269_v17, %v1552_v35 }
 0x21c   : > { %v2432_v41 = vpop.f32.mrf.mxu1  ;;  %v2544_v52 = vpop.f32.mrf.mxu0 }
 0x21d   : > { %2273 = vst [vmem:[%s3277_s20] sm:$0xff] %v2272_v38   ;;  %v1555_v48 = vadd.f32 %v2543_v40, %v2431_v39  ;;  %v1810_v51 = vmax.f32 %v1778_v44, 0.0 }
 0x21e   : > { %v2433_v49 = vpop.f32.mrf.mxu1  ;;  %v2545_v43 = vpop.f32.mrf.mxu0 }
 0x21f   : > { %v1779_v42 = vadd.f32 %v3269_v17, %v1555_v48  ;;  %v2434_v45 = vadd.f32 %v2433_v49, %v2432_v41  ;;  %v2546_v46 = vadd.f32 %v2545_v43, %v2544_v52 }
 0x220   : > { %v2435_v47 = vpop.f32.mrf.mxu1  ;;  %v2547_v50 = vpop.f32.mrf.mxu0 }
 0x221   : > { %v1811_v53 = vmax.f32 %v1779_v42, 0.0  ;;  %v1560_v60 = vadd.f32 %v2546_v46, %v2434_v45 }
 0x222   : > { %v2436_v61 = vpop.f32.mrf.mxu1  ;;  %v2548_v0 = vpop.f32.mrf.mxu0 }
 0x223   : > { %v2277_v54 = vpack.c.bf16 %v1811_v53, %v1810_v51  ;;  %v2437_v55 = vadd.f32 %v2436_v61, %v2435_v47  ;;  %v2549_v58 = vadd.f32 %v2548_v0, %v2547_v50  ;;  %v1780_v2 = vadd.f32 %v3269_v17, %v1560_v60 }
 0x224   : > { %v2438_v59 = vpop.f32.mrf.mxu1  ;;  %v2550_v1 = vpop.f32.mrf.mxu0 }
 0x225   : > { %2349 = vst [vmem:[%s3277_s20 + $0x8] sm:$0xff] %v2277_v54   ;;  %v1563_v3 = vadd.f32 %v2549_v58, %v2437_v55  ;;  %v1812_v7 = vmax.f32 %v1780_v2, 0.0 }
 0x226   : > { %v2439_v4 = vpop.f32.mrf.mxu1  ;;  %v2551_v56 = vpop.f32.mrf.mxu0 }
 0x227   : > { %v1781_v62 = vadd.f32 %v3269_v17, %v1563_v3  ;;  %v2440_v5 = vadd.f32 %v2439_v4, %v2438_v59  ;;  %v2552_v57 = vadd.f32 %v2551_v56, %v2550_v1 }
 0x228   : > { %v2441_v63 = vpop.f32.mrf.mxu1  ;;  %v2553_v6 = vpop.f32.mrf.mxu0 }
 0x229   : > { %v1813_v8 = vmax.f32 %v1781_v62, 0.0  ;;  %v1568_v9 = vadd.f32 %v2552_v57, %v2440_v5 }
 0x22a   : > { %v2442_v10 = vpop.f32.mrf.mxu1  ;;  %v2554_v11 = vpop.f32.mrf.mxu0 }
 0x22b   : > { %v2282_v12 = vpack.c.bf16 %v1813_v8, %v1812_v7  ;;  %v2443_v13 = vadd.f32 %v2442_v10, %v2441_v63  ;;  %v2555_v14 = vadd.f32 %v2554_v11, %v2553_v6  ;;  %v1782_v18 = vadd.f32 %v3269_v17, %v1568_v9 }
 0x22c   : > { %v2444_v15 = vpop.f32.mrf.mxu1  ;;  %v2556_v16 = vpop.f32.mrf.mxu0 }
 0x22d   : > { %2350 = vst [vmem:[%s3277_s20 + $0x10] sm:$0xff] %v2282_v12   ;;  %v1571_v19 = vadd.f32 %v2555_v14, %v2443_v13  ;;  %v1814_v27 = vmax.f32 %v1782_v18, 0.0 }
 0x22e   : > { %v2445_v20 = vpop.f32.mrf.mxu1  ;;  %v2557_v21 = vpop.f32.mrf.mxu0 }
 0x22f   : > { %v1783_v22 = vadd.f32 %v3269_v17, %v1571_v19  ;;  %v2446_v23 = vadd.f32 %v2445_v20, %v2444_v15  ;;  %v2558_v24 = vadd.f32 %v2557_v21, %v2556_v16 }
 0x230   : > { %v2447_v25 = vpop.f32.mrf.mxu1  ;;  %v2559_v26 = vpop.f32.mrf.mxu0 }
 0x231   : > { %v1815_v28 = vmax.f32 %v1783_v22, 0.0  ;;  %v1576_v29 = vadd.f32 %v2558_v24, %v2446_v23 }
 0x232   : > { %v2448_v30 = vpop.f32.mrf.mxu1  ;;  %v2560_v31 = vpop.f32.mrf.mxu0 }
 0x233   : > { %v2287_v32 = vpack.c.bf16 %v1815_v28, %v1814_v27  ;;  %v2449_v33 = vadd.f32 %v2448_v30, %v2447_v25  ;;  %v2561_v34 = vadd.f32 %v2560_v31, %v2559_v26  ;;  %v1784_v37 = vadd.f32 %v3269_v17, %v1576_v29 }
 0x234   : > { %v2450_v35 = vpop.f32.mrf.mxu1  ;;  %v2562_v36 = vpop.f32.mrf.mxu0 }
 0x235   : > { %2351 = vst [vmem:[%s3277_s20 + $0x18] sm:$0xff] %v2287_v32   ;;  %v1579_v38 = vadd.f32 %v2561_v34, %v2449_v33  ;;  %v1816_v43 = vmax.f32 %v1784_v37, 0.0 }
 0x236   : > { %v2451_v39 = vpop.f32.mrf.mxu1  ;;  %v2563_v40 = vpop.f32.mrf.mxu0 }
 0x237   : > { %v1785_v41 = vadd.f32 %v3269_v17, %v1579_v38  ;;  %v2452_v52 = vadd.f32 %v2451_v39, %v2450_v35  ;;  %v2564_v44 = vadd.f32 %v2563_v40, %v2562_v36 }
 0x238   : > { %v2453_v48 = vpop.f32.mrf.mxu1  ;;  %v2565_v49 = vpop.f32.mrf.mxu0 }
 0x239   : > { %v1817_v42 = vmax.f32 %v1785_v41, 0.0  ;;  %v1584_v45 = vadd.f32 %v2564_v44, %v2452_v52 }
 0x23a   : > { %v2454_v46 = vpop.f32.mrf.mxu1  ;;  %v2566_v47 = vpop.f32.mrf.mxu0 }
 0x23b   : > { %v2292_v50 = vpack.c.bf16 %v1817_v42, %v1816_v43  ;;  %v2455_v51 = vadd.f32 %v2454_v46, %v2453_v48  ;;  %v2567_v53 = vadd.f32 %v2566_v47, %v2565_v49  ;;  %v1786_v0 = vadd.f32 %v3269_v17, %v1584_v45 }
 0x23c   : > { %v2456_v60 = vpop.f32.mrf.mxu1  ;;  %v2568_v61 = vpop.f32.mrf.mxu0 }
 0x23d   : > { %2352 = vst [vmem:[%s3277_s20 + $0x20] sm:$0xff] %v2292_v50   ;;  %v1587_v54 = vadd.f32 %v2567_v53, %v2455_v51  ;;  %v1818_v56 = vmax.f32 %v1786_v0, 0.0 }
 0x23e   : > { %v2457_v55 = vpop.f32.mrf.mxu1  ;;  %v2569_v58 = vpop.f32.mrf.mxu0 }
 0x23f   : > { %v1787_v59 = vadd.f32 %v3269_v17, %v1587_v54  ;;  %v2458_v1 = vadd.f32 %v2457_v55, %v2456_v60  ;;  %v2570_v2 = vadd.f32 %v2569_v58, %v2568_v61 }
 0x240   : > { %v2459_v3 = vpop.f32.mrf.mxu1  ;;  %v2571_v4 = vpop.f32.mrf.mxu0 }
 0x241   : > { %v1819_v62 = vmax.f32 %v1787_v59, 0.0  ;;  %v1592_v5 = vadd.f32 %v2570_v2, %v2458_v1 }
 0x242   : > { %v2460_v57 = vpop.f32.mrf.mxu1  ;;  %v2572_v63 = vpop.f32.mrf.mxu0 }
 0x243   : > { %v2297_v6 = vpack.c.bf16 %v1819_v62, %v1818_v56  ;;  %v2461_v7 = vadd.f32 %v2460_v57, %v2459_v3  ;;  %v2573_v8 = vadd.f32 %v2572_v63, %v2571_v4  ;;  %v1788_v11 = vadd.f32 %v3269_v17, %v1592_v5 }
 0x244   : > { %v2462_v9 = vpop.f32.mrf.mxu1  ;;  %v2574_v10 = vpop.f32.mrf.mxu0 }
 0x245   : > { %2353 = vst [vmem:[%s3277_s20 + $0x28] sm:$0xff] %v2297_v6   ;;  %v1595_v12 = vadd.f32 %v2573_v8, %v2461_v7  ;;  %v1820_v21 = vmax.f32 %v1788_v11, 0.0 }
 0x246   : > { %v2463_v13 = vpop.f32.mrf.mxu1  ;;  %v2575_v14 = vpop.f32.mrf.mxu0 }
 0x247   : > { %v1789_v15 = vadd.f32 %v3269_v17, %v1595_v12  ;;  %v2464_v16 = vadd.f32 %v2463_v13, %v2462_v9  ;;  %v2576_v18 = vadd.f32 %v2575_v14, %v2574_v10 }
 0x248   : > { %v2465_v19 = vpop.f32.mrf.mxu1  ;;  %v2577_v20 = vpop.f32.mrf.mxu0 }
 0x249   : > { %v1821_v22 = vmax.f32 %v1789_v15, 0.0  ;;  %v1600_v23 = vadd.f32 %v2576_v18, %v2464_v16 }
 0x24a   : > { %v2466_v24 = vpop.f32.mrf.mxu1  ;;  %v2578_v25 = vpop.f32.mrf.mxu0 }
 0x24b   : > { %v2302_v26 = vpack.c.bf16 %v1821_v22, %v1820_v21  ;;  %v2467_v27 = vadd.f32 %v2466_v24, %v2465_v19  ;;  %v2579_v28 = vadd.f32 %v2578_v25, %v2577_v20  ;;  %v1790_v31 = vadd.f32 %v3269_v17, %v1600_v23 }
 0x24c   : > { %v2468_v29 = vpop.f32.mrf.mxu1  ;;  %v2580_v30 = vpop.f32.mrf.mxu0 }
 0x24d   : > { %2354 = vst [vmem:[%s3277_s20 + $0x30] sm:$0xff] %v2302_v26   ;;  %v1603_v32 = vadd.f32 %v2579_v28, %v2467_v27  ;;  %v1822_v40 = vmax.f32 %v1790_v31, 0.0 }
 0x24e   : > { %v2469_v33 = vpop.f32.mrf.mxu1  ;;  %v2581_v34 = vpop.f32.mrf.mxu0 }
 0x24f   : > { %v1791_v35 = vadd.f32 %v3269_v17, %v1603_v32  ;;  %v2470_v36 = vadd.f32 %v2469_v33, %v2468_v29  ;;  %v2582_v37 = vadd.f32 %v2581_v34, %v2580_v30 }
 0x250   : > { %v2471_v38 = vpop.f32.mrf.mxu1  ;;  %v2583_v39 = vpop.f32.mrf.mxu0 }
 0x251   : > { %v1823_v41 = vmax.f32 %v1791_v35, 0.0  ;;  %v1608_v52 = vadd.f32 %v2582_v37, %v2470_v36 }
 0x252   : > { %v2472_v44 = vpop.f32.mrf.mxu1  ;;  %v2584_v48 = vpop.f32.mrf.mxu0 }
 0x253   : > { %v2307_v49 = vpack.c.bf16 %v1823_v41, %v1822_v40  ;;  %v2473_v43 = vadd.f32 %v2472_v44, %v2471_v38  ;;  %v2585_v42 = vadd.f32 %v2584_v48, %v2583_v39  ;;  %v1792_v47 = vadd.f32 %v3269_v17, %v1608_v52 }
 0x254   : > { %v2474_v45 = vpop.f32.mrf.mxu1  ;;  %v2586_v46 = vpop.f32.mrf.mxu0 }
 0x255   : > { %2355 = vst [vmem:[%s3277_s20 + $0x38] sm:$0xff] %v2307_v49   ;;  %v1611_v50 = vadd.f32 %v2585_v42, %v2473_v43  ;;  %v1824_v58 = vmax.f32 %v1792_v47, 0.0 }
 0x256   : > { %v2475_v51 = vpop.f32.mrf.mxu1  ;;  %v2587_v53 = vpop.f32.mrf.mxu0 }
 0x257   : > { %v1793_v60 = vadd.f32 %v3269_v17, %v1611_v50  ;;  %v2476_v61 = vadd.f32 %v2475_v51, %v2474_v45  ;;  %v2588_v0 = vadd.f32 %v2587_v53, %v2586_v46 }
 0x258   : > { %v2477_v54 = vpop.f32.mrf.mxu1  ;;  %v2589_v55 = vpop.f32.mrf.mxu0 }
 0x259   : > { %v1825_v59 = vmax.f32 %v1793_v60, 0.0  ;;  %v1616_v1 = vadd.f32 %v2588_v0, %v2476_v61 }
 0x25a   : > { %v2478_v2 = vpop.f32.mrf.mxu1  ;;  %v2590_v3 = vpop.f32.mrf.mxu0 }
 0x25b   : > { %v2312_v4 = vpack.c.bf16 %v1825_v59, %v1824_v58  ;;  %v2479_v56 = vadd.f32 %v2478_v2, %v2477_v54  ;;  %v2591_v62 = vadd.f32 %v2590_v3, %v2589_v55  ;;  %v1794_v63 = vadd.f32 %v3269_v17, %v1616_v1 }
 0x25c   : > { %v2480_v5 = vpop.f32.mrf.mxu1  ;;  %v2592_v57 = vpop.f32.mrf.mxu0 }
 0x25d   : > { %2356 = vst [vmem:[%s3277_s20 + $0x40] sm:$0xff] %v2312_v4   ;;  %v1619_v6 = vadd.f32 %v2591_v62, %v2479_v56  ;;  %v1826_v14 = vmax.f32 %v1794_v63, 0.0 }
 0x25e   : > { %v2481_v7 = vpop.f32.mrf.mxu1  ;;  %v2593_v8 = vpop.f32.mrf.mxu0 }
 0x25f   : > { %v1795_v9 = vadd.f32 %v3269_v17, %v1619_v6  ;;  %v2482_v10 = vadd.f32 %v2481_v7, %v2480_v5  ;;  %v2594_v11 = vadd.f32 %v2593_v8, %v2592_v57 }
 0x260   : > { %v2483_v12 = vpop.f32.mrf.mxu1  ;;  %v2595_v13 = vpop.f32.mrf.mxu0 }
 0x261   : > { %v1827_v15 = vmax.f32 %v1795_v9, 0.0  ;;  %v1624_v16 = vadd.f32 %v2594_v11, %v2482_v10 }
 0x262   : > { %v2484_v18 = vpop.f32.mrf.mxu1  ;;  %v2596_v19 = vpop.f32.mrf.mxu0 }
 0x263   : > { %v2317_v20 = vpack.c.bf16 %v1827_v15, %v1826_v14  ;;  %v2485_v21 = vadd.f32 %v2484_v18, %v2483_v12  ;;  %v2597_v22 = vadd.f32 %v2596_v19, %v2595_v13  ;;  %v1796_v25 = vadd.f32 %v3269_v17, %v1624_v16 }
 0x264   : > { %v2486_v23 = vpop.f32.mrf.mxu1  ;;  %v2598_v24 = vpop.f32.mrf.mxu0 }
 0x265   : > { %2357 = vst [vmem:[%s3277_s20 + $0x48] sm:$0xff] %v2317_v20   ;;  %v1627_v26 = vadd.f32 %v2597_v22, %v2485_v21  ;;  %v1828_v34 = vmax.f32 %v1796_v25, 0.0 }
 0x266   : > { %v2487_v27 = vpop.f32.mrf.mxu1  ;;  %v2599_v28 = vpop.f32.mrf.mxu0 }
 0x267   : > { %v1797_v29 = vadd.f32 %v3269_v17, %v1627_v26  ;;  %v2488_v30 = vadd.f32 %v2487_v27, %v2486_v23  ;;  %v2600_v31 = vadd.f32 %v2599_v28, %v2598_v24 }
 0x268   : > { %v2489_v32 = vpop.f32.mrf.mxu1  ;;  %v2601_v33 = vpop.f32.mrf.mxu0 }
 0x269   : > { %v1829_v35 = vmax.f32 %v1797_v29, 0.0  ;;  %v1632_v36 = vadd.f32 %v2600_v31, %v2488_v30 }
 0x26a   : > { %v2490_v37 = vpop.f32.mrf.mxu1  ;;  %v2602_v38 = vpop.f32.mrf.mxu0 }
 0x26b   : > { %v2322_v39 = vpack.c.bf16 %v1829_v35, %v1828_v34  ;;  %v2491_v40 = vadd.f32 %v2490_v37, %v2489_v32  ;;  %v2603_v41 = vadd.f32 %v2602_v38, %v2601_v33  ;;  %v1798_v48 = vadd.f32 %v3269_v17, %v1632_v36 }
 0x26c   : > { %v2492_v52 = vpop.f32.mrf.mxu1  ;;  %v2604_v44 = vpop.f32.mrf.mxu0 }
 0x26d   : > { %2358 = vst [vmem:[%s3277_s20 + $0x50] sm:$0xff] %v2322_v39   ;;  %v1635_v49 = vadd.f32 %v2603_v41, %v2491_v40  ;;  %v1830_v53 = vmax.f32 %v1798_v48, 0.0 }
 0x26e   : > { %v2493_v43 = vpop.f32.mrf.mxu1  ;;  %v2605_v42 = vpop.f32.mrf.mxu0 }
 0x26f   : > { %v1799_v45 = vadd.f32 %v3269_v17, %v1635_v49  ;;  %v2494_v46 = vadd.f32 %v2493_v43, %v2492_v52  ;;  %v2606_v47 = vadd.f32 %v2605_v42, %v2604_v44 }
 0x270   : > { %v2495_v50 = vpop.f32.mrf.mxu1  ;;  %v2607_v51 = vpop.f32.mrf.mxu0 }
 0x271   : > { %v1831_v60 = vmax.f32 %v1799_v45, 0.0  ;;  %v1640_v61 = vadd.f32 %v2606_v47, %v2494_v46 }
 0x272   : > { %v2496_v0 = vpop.f32.mrf.mxu1  ;;  %v2608_v54 = vpop.f32.mrf.mxu0 }
 0x273   : > { %v2327_v55 = vpack.c.bf16 %v1831_v60, %v1830_v53  ;;  %v2497_v58 = vadd.f32 %v2496_v0, %v2495_v50  ;;  %v2609_v59 = vadd.f32 %v2608_v54, %v2607_v51  ;;  %v1800_v3 = vadd.f32 %v3269_v17, %v1640_v61 }
 0x274   : > { %v2498_v1 = vpop.f32.mrf.mxu1  ;;  %v2610_v2 = vpop.f32.mrf.mxu0 }
 0x275   : > { %2359 = vst [vmem:[%s3277_s20 + $0x58] sm:$0xff] %v2327_v55   ;;  %v1643_v4 = vadd.f32 %v2609_v59, %v2497_v58  ;;  %v1832_v8 = vmax.f32 %v1800_v3, 0.0 }
 0x276   : > { %v2499_v56 = vpop.f32.mrf.mxu1  ;;  %v2611_v62 = vpop.f32.mrf.mxu0 }
 0x277   : > { %v1801_v5 = vadd.f32 %v3269_v17, %v1643_v4  ;;  %v2500_v57 = vadd.f32 %v2499_v56, %v2498_v1  ;;  %v2612_v63 = vadd.f32 %v2611_v62, %v2610_v2 }
 0x278   : > { %v2501_v6 = vpop.f32.mrf.mxu1  ;;  %v2613_v7 = vpop.f32.mrf.mxu0 }
 0x279   : > { %v1833_v9 = vmax.f32 %v1801_v5, 0.0  ;;  %v1648_v10 = vadd.f32 %v2612_v63, %v2500_v57 }
 0x27a   : > { %v2502_v11 = vpop.f32.mrf.mxu1  ;;  %v2614_v12 = vpop.f32.mrf.mxu0 }
 0x27b   : > { %v2332_v13 = vpack.c.bf16 %v1833_v9, %v1832_v8  ;;  %v2503_v14 = vadd.f32 %v2502_v11, %v2501_v6  ;;  %v2615_v15 = vadd.f32 %v2614_v12, %v2613_v7  ;;  %v1802_v19 = vadd.f32 %v3269_v17, %v1648_v10 }
 0x27c   : > { %v2504_v16 = vpop.f32.mrf.mxu1  ;;  %v2616_v18 = vpop.f32.mrf.mxu0 }
 0x27d   : > { %2360 = vst [vmem:[%s3277_s20 + $0x60] sm:$0xff] %v2332_v13   ;;  %v1651_v20 = vadd.f32 %v2615_v15, %v2503_v14  ;;  %v1834_v28 = vmax.f32 %v1802_v19, 0.0 }
 0x27e   : > { %v2505_v21 = vpop.f32.mrf.mxu1  ;;  %v2617_v22 = vpop.f32.mrf.mxu0 }
 0x27f   : > { %v1803_v23 = vadd.f32 %v3269_v17, %v1651_v20  ;;  %v2506_v24 = vadd.f32 %v2505_v21, %v2504_v16  ;;  %v2618_v25 = vadd.f32 %v2617_v22, %v2616_v18 }
 0x280   : > { %v2507_v26 = vpop.f32.mrf.mxu1  ;;  %v2619_v27 = vpop.f32.mrf.mxu0 }
 0x281   : > { %v1835_v29 = vmax.f32 %v1803_v23, 0.0  ;;  %v1656_v30 = vadd.f32 %v2618_v25, %v2506_v24 }
 0x282   : > { %v2508_v31 = vpop.f32.mrf.mxu1  ;;  %v2620_v32 = vpop.f32.mrf.mxu0 }
 0x283   : > { %v2337_v33 = vpack.c.bf16 %v1835_v29, %v1834_v28  ;;  %v2509_v34 = vadd.f32 %v2508_v31, %v2507_v26  ;;  %v2621_v35 = vadd.f32 %v2620_v32, %v2619_v27  ;;  %v1804_v38 = vadd.f32 %v3269_v17, %v1656_v30 }
 0x284   : > { %v2510_v36 = vpop.f32.mrf.mxu1  ;;  %v2622_v37 = vpop.f32.mrf.mxu0 }
 0x285   : > { %2361 = vst [vmem:[%s3277_s20 + $0x68] sm:$0xff] %v2337_v33   ;;  %v1659_v39 = vadd.f32 %v2621_v35, %v2509_v34  ;;  %v1836_v42 = vmax.f32 %v1804_v38, 0.0 }
 0x286   : > { %v2511_v40 = vpop.f32.mrf.mxu1  ;;  %v2623_v41 = vpop.f32.mrf.mxu0 }
 0x287   : > { %v1805_v52 = vadd.f32 %v3269_v17, %v1659_v39  ;;  %v2512_v44 = vadd.f32 %v2511_v40, %v2510_v36  ;;  %v2624_v48 = vadd.f32 %v2623_v41, %v2622_v37 }
 0x288   : > { %v2513_v49 = vpop.f32.mrf.mxu1  ;;  %v2625_v43 = vpop.f32.mrf.mxu0 }
 0x289   : > { %v1837_v45 = vmax.f32 %v1805_v52, 0.0  ;;  %v1664_v46 = vadd.f32 %v2624_v48, %v2512_v44 }
 0x28a   : > { %v2514_v47 = vpop.f32.mrf.mxu1  ;;  %v2626_v50 = vpop.f32.mrf.mxu0 }
 0x28b   : > { %v2342_v51 = vpack.c.bf16 %v1837_v45, %v1836_v42  ;;  %v2515_v53 = vadd.f32 %v2514_v47, %v2513_v49  ;;  %v2627_v60 = vadd.f32 %v2626_v50, %v2625_v43  ;;  %v1806_v61 = vadd.f32 %v3269_v17, %v1664_v46 }
 0x28d   : > { %2362 = vst [vmem:[%s3277_s20 + $0x70] sm:$0xff] %v2342_v51   ;;  %v1667_v0 = vadd.f32 %v2627_v60, %v2515_v53  ;;  %v1838_v55 = vmax.f32 %v1806_v61, 0.0 }
 0x28f   : > { %v1807_v54 = vadd.f32 %v3269_v17, %v1667_v0 }
 0x291   : > { %v1839_v58 = vmax.f32 %v1807_v54, 0.0 }
 0x293   : > { %v2347_v59 = vpack.c.bf16 %v1839_v58, %v1838_v55 }
 0x295   : > { %2363 = vst [vmem:[%s3277_s20 + $0x78] sm:$0xff] %v2347_v59  }
 0x296 PF: > { %s14_s17 = sadd.s32 1, %s2906_s17   ;;  %s3375_s15 = smov %s2902_s16 }
 0x297   : > { %p11_p5 = scmp.ge.s32.totalorder %s14_s17, 4   ;;  %s3376_s16 = smov %s3378_s18 }
 0x299   :  { %13 = sbr.rel (!%p11_p5) target bundleno = 2 (0x2), region = 77 }

// kernel: gcn_model_forward.6
= control target key start
LH: loop header
LB: loop body
LE: loop exit
PB: predicated region body
PF: predicated region fallthrough
CT: control target
= control target key end

     0   :  { %s2901_s15 = smov 0   ;;  %s2903_s16 = smov 0   ;;  %s3302_s0 = inlined_call_operand.vmem [shape: bf16[512,512], index: 0, kind: input, shape index: {}]   ;;  %s3303_s1 = inlined_call_operand.vmem [shape: bf16[512,128], index: 1, kind: input, shape index: {}]   ;;  %s3304_s2 = inlined_call_operand.vmem [shape: bf16[128,128], index: 2, kind: input, shape index: {}]   ;;  %s3305_s3 = inlined_call_operand.vmem [shape: f32[1,128], index: 3, kind: input, shape index: {}]   ;;  %s3306_s4 = inlined_call_operand.vmem [shape: bf16[512,128], index: 4, kind: output, shape index: {}]  }
   0x1   :  { %s2905_s17 = smov 0  }
   0x2 LB: > { %s26_s18 = sadd.s32 1, %s2870_s16  ;;  %p2059_p0 = scmp.ge.s32.totalorder %s2874_s17, 1  ;;  %s2874_s17 = sphi %s2905_s17, %s14_s17   ;;  %s2870_s16 = sphi %s2903_s16, %s3344_s16   ;;  %s2866_s15 = sphi %s2901_s15, %s3343_s15  }
   0x3   : > { %p28_p1 = scmp.ge.s32.totalorder %s26_s18, 2  ;;  %p194_p2 = scmp.lt.s32.totalorder %s2874_s17, 3 }
   0x5   : > { %s3346_s18 = smov (%p28_p1, %s26_s18), 0  ;;  %p195_p3 = pnand %p2059_p0, %p194_p2 }
   0x7   : > { %198 = sbr.rel (%p195_p3) target bundleno = 660 (0x294), region = 36 }
   0xc   : > { %v2716_v0 = vld [vmem:[%s3304_s2 + $0x38] sm:$0xff]   ;;  %v2717_v1 = vld [vmem:[%s3304_s2 + $0x30] sm:$0xff]   ;;  %v2718_v2 = vld [vmem:[%s3304_s2 + $0x28] sm:$0xff]   ;;  %s2060_s7 = sshll.u32 %s2866_s15, 5 }
   0xd   : > { %2596 = vmatprep.subr.bf16.mxu0 %v2716_v0  ;;  %2676 = vmatprep.subr.bf16.mxu1 %v2716_v0  ;;  %v2719_v3 = vld [vmem:[%s3304_s2 + $0x20] sm:$0xff]   ;;  %v2720_v6 = vld [vmem:[%s3304_s2 + $0x18] sm:$0xff]   ;;  %v2721_v7 = vld [vmem:[%s3304_s2 + $0x10] sm:$0xff]   ;;  %p232_p4 = scmp.lt.s32.totalorder %s2060_s7, 63 }
   0xe   : > { %2597 = vmatpush3.bf16.msra.mxu0 %v2716_v0  ;;  %2684 = vmatpush3.bf16.msra.mxu1 %v2716_v0  ;;  %v2724_v4 = vld [vmem:[%s3303_s1] sm:$0xff]   ;;  %v2722_v8 = vld [vmem:[%s3304_s2 + $0x8] sm:$0xff]   ;;  %v2728_v12 = vld [vmem:[%s3303_s1 + $0x10] sm:$0xff]  }
   0xf   : > { %2598 = vmatprep.subr.bf16.mxu0 %v2717_v1  ;;  %2677 = vmatprep.subr.bf16.mxu1 %v2717_v1  ;;  %v2725_v5 = vld [vmem:[%s3303_s1 + $0x80] sm:$0xff]   ;;  %v2726_v10 = vld [vmem:[%s3303_s1 + $0x8] sm:$0xff]   ;;  %v2729_v13 = vld [vmem:[%s3303_s1 + $0x90] sm:$0xff]   ;;  %s3348_s7 = smov (!%p232_p4, %s2060_s7), 63 }
  0x10   : > { %2612 = vmatprep.mubr.bf16.mxu0 %v2724_v4  ;;  %2644 = vmatprep.mubr.bf16.mxu1 %v2725_v5  ;;  %v2723_v9 = vld [vmem:[%s3304_s2] sm:$0xff]   ;;  %v2727_v11 = vld [vmem:[%s3303_s1 + $0x88] sm:$0xff]   ;;  %v2730_v14 = vld [vmem:[%s3303_s1 + $0x18] sm:$0xff]   ;;  %s2204_s8 = sshll.u32 %s3348_s7, 4  ;;  %s2064_s13 = sshll.u32 %s3348_s7, 2 }
  0x11   : > { %v2731_v15 = vld [vmem:[%s3303_s1 + $0x98] sm:$0xff]   ;;  %v2732_v16 = vld [vmem:[%s3303_s1 + $0x20] sm:$0xff]   ;;  %v2734_v18 = vld [vmem:[%s3303_s1 + $0x28] sm:$0xff]   ;;  %s3048_s11 = scalar_lea.vmem %s3302_s0, %s2204_s8  ;;  %s3245_s20 = scalar_lea.vmem %s3306_s4, %s2064_s13 }
  0x12   : > { %2599 = vmatpush3.bf16.msra.mxu0 %v2717_v1  ;;  %2685 = vmatpush3.bf16.msra.mxu1 %v2717_v1  ;;  %v2733_v17 = vld [vmem:[%s3303_s1 + $0xa0] sm:$0xff]   ;;  %v2735_v19 = vld [vmem:[%s3303_s1 + $0xa8] sm:$0xff]   ;;  %v2736_v20 = vld [vmem:[%s3303_s1 + $0x30] sm:$0xff]  }
  0x13   : > { %2600 = vmatprep.subr.bf16.mxu0 %v2718_v2  ;;  %2678 = vmatprep.subr.bf16.mxu1 %v2718_v2  ;;  %v2737_v21 = vld [vmem:[%s3303_s1 + $0xb0] sm:$0xff]   ;;  %v2738_v22 = vld [vmem:[%s3303_s1 + $0x38] sm:$0xff]   ;;  %v2740_v24 = vld [vmem:[%s3303_s1 + $0x40] sm:$0xff]  }
  0x14   : > { %v2739_v23 = vld [vmem:[%s3303_s1 + $0xb8] sm:$0xff]   ;;  %v2741_v25 = vld [vmem:[%s3303_s1 + $0xc0] sm:$0xff]   ;;  %v2742_v26 = vld [vmem:[%s3303_s1 + $0x48] sm:$0xff]  }
  0x15   : > { %v2743_v27 = vld [vmem:[%s3303_s1 + $0xc8] sm:$0xff]   ;;  %v2744_v28 = vld [vmem:[%s3303_s1 + $0x50] sm:$0xff]   ;;  %v2746_v30 = vld [vmem:[%s3303_s1 + $0x58] sm:$0xff]  }
  0x16   : > { %2601 = vmatpush3.bf16.msra.mxu0 %v2718_v2  ;;  %2686 = vmatpush3.bf16.msra.mxu1 %v2718_v2  ;;  %v2745_v29 = vld [vmem:[%s3303_s1 + $0xd0] sm:$0xff]   ;;  %v2747_v31 = vld [vmem:[%s3303_s1 + $0xd8] sm:$0xff]   ;;  %v2748_v32 = vld [vmem:[%s3303_s1 + $0x60] sm:$0xff]  }
  0x17   : > { %2602 = vmatprep.subr.bf16.mxu0 %v2719_v3  ;;  %2679 = vmatprep.subr.bf16.mxu1 %v2719_v3  ;;  %v2749_v33 = vld [vmem:[%s3303_s1 + $0xe0] sm:$0xff]   ;;  %v2750_v34 = vld [vmem:[%s3303_s1 + $0x68] sm:$0xff]   ;;  %v2752_v36 = vld [vmem:[%s3303_s1 + $0x70] sm:$0xff]  }
  0x18   : > { %v2751_v35 = vld [vmem:[%s3303_s1 + $0xe8] sm:$0xff]   ;;  %v2753_v37 = vld [vmem:[%s3303_s1 + $0xf0] sm:$0xff]   ;;  %v2754_v38 = vld [vmem:[%s3303_s1 + $0x78] sm:$0xff]  }
  0x19   : > { %v2755_v39 = vld [vmem:[%s3303_s1 + $0xf8] sm:$0xff]   ;;  %v2758_v40 = vld [vmem:[%s3048_s11 + $0x4] ss:$16 sps:$4 sm:$0xff]  }
  0x1a   : > { %2603 = vmatpush3.bf16.msra.mxu0 %v2719_v3  ;;  %2687 = vmatpush3.bf16.msra.mxu1 %v2719_v3  ;;  %v2761_v41 = vld [vmem:[%s3048_s11 + $0xc] ss:$16 sps:$4 sm:$0xff]  }
  0x1b   : > { %2604 = vmatprep.subr.bf16.mxu0 %v2720_v6  ;;  %2680 = vmatprep.subr.bf16.mxu1 %v2720_v6 }
  0x1e   : > { %2605 = vmatpush3.bf16.msra.mxu0 %v2720_v6  ;;  %2688 = vmatpush3.bf16.msra.mxu1 %v2720_v6 }
  0x1f   : > { %2606 = vmatprep.subr.bf16.mxu0 %v2721_v7  ;;  %2681 = vmatprep.subr.bf16.mxu1 %v2721_v7 }
  0x22   : > { %2607 = vmatpush3.bf16.msra.mxu0 %v2721_v7  ;;  %2689 = vmatpush3.bf16.msra.mxu1 %v2721_v7 }
  0x23   : > { %2608 = vmatprep.subr.bf16.mxu0 %v2722_v8  ;;  %2682 = vmatprep.subr.bf16.mxu1 %v2722_v8 }
  0x26   : > { %2609 = vmatpush3.bf16.msra.mxu0 %v2722_v8  ;;  %2690 = vmatpush3.bf16.msra.mxu1 %v2722_v8 }
  0x27   : > { %2610 = vmatprep.subr.bf16.mxu0 %v2723_v9  ;;  %2683 = vmatprep.subr.bf16.mxu1 %v2723_v9 }
  0x2a   : > { %2611 = vmatpush3.bf16.msra.mxu0 %v2723_v9  ;;  %2691 = vmatpush3.bf16.msra.mxu1 %v2723_v9 }
  0x2d   : > { %2613 = vmatmul.mubr.bf16.vlgmr.msra.gmra.mxu0 %v2726_v10  ;;  %2645 = vmatmul.mubr.bf16.vlgmr.msra.gmra.mxu1 %v2727_v11 }
  0x2e   : > { %2616 = vmatprep.mubr.bf16.mxu0 %v2728_v12  ;;  %2648 = vmatprep.mubr.bf16.mxu1 %v2729_v13 }
  0x35   : > { %2617 = vmatmul.mubr.bf16.gmra.mxu0 %v2730_v14  ;;  %2649 = vmatmul.mubr.bf16.gmra.mxu1 %v2731_v15 }
  0x36   : > { %2620 = vmatprep.mubr.bf16.mxu0 %v2732_v16  ;;  %2652 = vmatprep.mubr.bf16.mxu1 %v2733_v17 }
  0x3d   : > { %2621 = vmatmul.mubr.bf16.gmra.mxu0 %v2734_v18  ;;  %2653 = vmatmul.mubr.bf16.gmra.mxu1 %v2735_v19 }
  0x3e   : > { %2624 = vmatprep.mubr.bf16.mxu0 %v2736_v20  ;;  %2656 = vmatprep.mubr.bf16.mxu1 %v2737_v21 }
  0x45   : > { %2625 = vmatmul.mubr.bf16.gmra.mxu0 %v2738_v22  ;;  %2657 = vmatmul.mubr.bf16.gmra.mxu1 %v2739_v23 }
  0x46   : > { %2628 = vmatprep.mubr.bf16.mxu0 %v2740_v24  ;;  %2660 = vmatprep.mubr.bf16.mxu1 %v2741_v25 }
  0x4d   : > { %2629 = vmatmul.mubr.bf16.gmra.mxu0 %v2742_v26  ;;  %2661 = vmatmul.mubr.bf16.gmra.mxu1 %v2743_v27 }
  0x4e   : > { %2632 = vmatprep.mubr.bf16.mxu0 %v2744_v28  ;;  %2664 = vmatprep.mubr.bf16.mxu1 %v2745_v29 }
  0x55   : > { %2633 = vmatmul.mubr.bf16.gmra.mxu0 %v2746_v30  ;;  %2665 = vmatmul.mubr.bf16.gmra.mxu1 %v2747_v31 }
  0x56   : > { %2636 = vmatprep.mubr.bf16.mxu0 %v2748_v32  ;;  %2668 = vmatprep.mubr.bf16.mxu1 %v2749_v33 }
  0x5d   : > { %2637 = vmatmul.mubr.bf16.gmra.mxu0 %v2750_v34  ;;  %2669 = vmatmul.mubr.bf16.gmra.mxu1 %v2751_v35 }
  0x5e   : > { %2640 = vmatprep.mubr.bf16.mxu0 %v2752_v36  ;;  %2672 = vmatprep.mubr.bf16.mxu1 %v2753_v37 }
  0x65   : > { %2641 = vmatmul.mubr.bf16.gmra.mxu0 %v2754_v38  ;;  %2673 = vmatmul.mubr.bf16.gmra.mxu1 %v2755_v39 }
  0x66   : > { %1380 = vmatprep.mubr.bf16.mxu1 %v2758_v40  ;;  %1541 = vmatprep.mubr.bf16.mxu0 %v2761_v41 }
  0xed   : > { %v3052_v42 = vpop.f32.mrf.mxu0  ;;  %v3054_v43 = vpop.f32.mrf.mxu1 }
  0xee   : > { %3315 = vst [vmem:[#allocation3_spill] sm:$0xff] %v3052_v42  ;;  %3316 = vst [vmem:[#allocation4_spill] sm:$0xff] %v3054_v43 }
  0xef   : > { %v3056_v44 = vpop.f32.mrf.mxu0  ;;  %v3058_v45 = vpop.f32.mrf.mxu1 }
  0xf0   : > { %3317 = vst [vmem:[#allocation5_spill] sm:$0xff] %v3056_v44  ;;  %3318 = vst [vmem:[#allocation6_spill] sm:$0xff] %v3058_v45 }
  0xf1   : > { %v3060_v46 = vpop.f32.mrf.mxu0  ;;  %v3062_v47 = vpop.f32.mrf.mxu1 }
  0xf2   : > { %3319 = vst [vmem:[#allocation7_spill] sm:$0xff] %v3060_v46  ;;  %3320 = vst [vmem:[#allocation8_spill] sm:$0xff] %v3062_v47 }
  0xf3   : > { %v3068_v50 = vpop.f32.mrf.mxu0  ;;  %v3070_v51 = vpop.f32.mrf.mxu1 }
  0xf4   : > { %3321 = vst [vmem:[#allocation9_spill] sm:$0xff] %v3068_v50  ;;  %3322 = vst [vmem:[#allocation10_spill] sm:$0xff] %v3070_v51 }
  0xf5   : > { %v3076_v54 = vpop.f32.mrf.mxu0  ;;  %v3078_v55 = vpop.f32.mrf.mxu1 }
  0xf7   : > { %v3080_v56 = vpop.f32.mrf.mxu0  ;;  %v3082_v57 = vpop.f32.mrf.mxu1 }
  0xf9   : > { %v3084_v58 = vpop.f32.mrf.mxu0  ;;  %v3086_v59 = vpop.f32.mrf.mxu1 }
  0xfb   : > { %v3092_v62 = vpop.f32.mrf.mxu0  ;;  %v3094_v63 = vpop.f32.mrf.mxu1 }
  0xfd   : > { %v3100_v2 = vpop.f32.mrf.mxu0  ;;  %v3102_v3 = vpop.f32.mrf.mxu1 }
  0xff   : > { %v3104_v4 = vpop.f32.mrf.mxu0  ;;  %v3106_v5 = vpop.f32.mrf.mxu1 }
 0x101   : > { %v3108_v6 = vpop.f32.mrf.mxu0  ;;  %v3110_v7 = vpop.f32.mrf.mxu1 }
 0x103   : > { %v3112_v8 = vpop.f32.mrf.mxu0  ;;  %v3114_v9 = vpop.f32.mrf.mxu1 }
 0x105   : > { %v2626_v10 = vpop.f32.mrf.mxu0  ;;  %v2658_v11 = vpop.f32.mrf.mxu1 }
 0x107   : > { %v693_v12 = vpop.f32.mrf.mxu0  ;;  %v821_v13 = vpop.f32.mrf.mxu1 }
 0x109   : > { %v2627_v14 = vpop.f32.mrf.mxu0  ;;  %v2659_v15 = vpop.f32.mrf.mxu1 }
 0x10a   : > { %v1003_v45 = vpack.c.bf16 %v2627_v14, %v2626_v10  ;;  %v1019_v51 = vpack.c.bf16 %v2659_v15, %v2658_v11  ;;  %v3341_v10 = vld [vmem:[#allocation6_spill] sm:$0xff]  ;;  %v2766_v14 = vld [vmem:[%s3048_s11 + $0x20] ss:$16 sps:$4 sm:$0xff]  }
 0x10b   : > { %v696_v16 = vpop.f32.mrf.mxu0  ;;  %v824_v17 = vpop.f32.mrf.mxu1  ;;  %v2767_v15 = vld [vmem:[%s3048_s11 + $0x28] ss:$16 sps:$4 sm:$0xff]  }
 0x10c   : > { %v1002_v42 = vpack.c.bf16 %v696_v16, %v693_v12  ;;  %v1018_v46 = vpack.c.bf16 %v824_v17, %v821_v13  ;;  %v2762_v12 = vld [vmem:[%s3048_s11 + $0x24] ss:$16 sps:$4 sm:$0xff]   ;;  %v2764_v13 = vld [vmem:[%s3048_s11 + $0x2c] ss:$16 sps:$4 sm:$0xff]  }
 0x10d   : > { %v3116_v18 = vpop.f32.mrf.mxu0  ;;  %v3118_v19 = vpop.f32.mrf.mxu1  ;;  %v2768_v16 = vld [vmem:[%s3048_s11 + $0x44] ss:$16 sps:$4 sm:$0xff]   ;;  %v2770_v17 = vld [vmem:[%s3048_s11 + $0x4c] ss:$16 sps:$4 sm:$0xff]  }
 0x10f   : > { %v3120_v20 = vpop.f32.mrf.mxu0  ;;  %v3122_v21 = vpop.f32.mrf.mxu1 }
 0x110   : > { %3323 = vst [vmem:[#allocation11_spill] sm:$0xff] %v3122_v21 }
 0x111   : > { %v3124_v22 = vpop.f32.mrf.mxu0  ;;  %v3126_v23 = vpop.f32.mrf.mxu1 }
 0x113   : > { %v3128_v24 = vpop.f32.mrf.mxu0  ;;  %v3130_v25 = vpop.f32.mrf.mxu1 }
 0x114   : > { %3324 = vst [vmem:[#allocation12_spill] sm:$0xff] %v3130_v25 }
 0x115   : > { %v2634_v26 = vpop.f32.mrf.mxu0  ;;  %v2666_v27 = vpop.f32.mrf.mxu1 }
 0x117   : > { %v725_v28 = vpop.f32.mrf.mxu0  ;;  %v853_v29 = vpop.f32.mrf.mxu1 }
 0x119   : > { %v2635_v30 = vpop.f32.mrf.mxu0  ;;  %v2667_v31 = vpop.f32.mrf.mxu1 }
 0x11b   : > { %v728_v32 = vpop.f32.mrf.mxu0  ;;  %v856_v33 = vpop.f32.mrf.mxu1 }
 0x11d   : > { %v2638_v34 = vpop.f32.mrf.mxu0  ;;  %v2670_v35 = vpop.f32.mrf.mxu1 }
 0x11f   : > { %v741_v36 = vpop.f32.mrf.mxu0  ;;  %v869_v37 = vpop.f32.mrf.mxu1 }
 0x121   : > { %v2639_v38 = vpop.f32.mrf.mxu0  ;;  %v2671_v39 = vpop.f32.mrf.mxu1 }
 0x122   : > { %v1009_v25 = vpack.c.bf16 %v2639_v38, %v2638_v34  ;;  %v1025_v21 = vpack.c.bf16 %v2671_v39, %v2670_v35  ;;  %v2796_v34 = vld [vmem:[%s3048_s11 + $0xc0] ss:$16 sps:$4 sm:$0xff]   ;;  %v2797_v35 = vld [vmem:[%s3048_s11 + $0xc8] ss:$16 sps:$4 sm:$0xff]  }
 0x123   : > { %v744_v40 = vpop.f32.mrf.mxu0  ;;  %v872_v41 = vpop.f32.mrf.mxu1  ;;  %v2802_v38 = vld [vmem:[%s3048_s11 + $0xe0] ss:$16 sps:$4 sm:$0xff]   ;;  %v2803_v39 = vld [vmem:[%s3048_s11 + $0xe8] ss:$16 sps:$4 sm:$0xff]  }
 0x125   : > { %v2642_v53 = vpop.f32.mrf.mxu0  ;;  %v2674_v52 = vpop.f32.mrf.mxu1 }
 0x127   : > { %v757_v49 = vpop.f32.mrf.mxu0  ;;  %v885_v48 = vpop.f32.mrf.mxu1 }
 0x129   : > { %v2643_v1 = vpop.f32.mrf.mxu0  ;;  %v2675_v0 = vpop.f32.mrf.mxu1 }
 0x12a   : > { %v1011_v61 = vpack.c.bf16 %v2643_v1, %v2642_v53  ;;  %v1027_v60 = vpack.c.bf16 %v2675_v0, %v2674_v52  ;;  %v1001_v52 = vpack.c.bf16 %v3108_v6, %v3100_v2  ;;  %v3326_v53 = vpack.c.bf16 %v3086_v59, %v3078_v55  ;;  %v3330_v59 = vld [vmem:[#allocation12_spill] sm:$0xff]  ;;  %v3331_v2 = vld [vmem:[#allocation7_spill] sm:$0xff]  ;;  %v3337_v6 = vld [vmem:[#allocation9_spill] sm:$0xff] }
 0x12b   : > { %v760_v44 = vpop.f32.mrf.mxu0  ;;  %v888_v50 = vpop.f32.mrf.mxu1  ;;  %v3327_v0 = vpack.c.bf16 %v3092_v62, %v3080_v56  ;;  %v1004_v55 = vpack.c.bf16 %v3128_v24, %v3120_v20  ;;  %v3334_v56 = vld [vmem:[#allocation8_spill] sm:$0xff]  ;;  %v2774_v20 = vld [vmem:[%s3048_s11 + $0x64] ss:$16 sps:$4 sm:$0xff]  }
 0x12c   : > { %v1010_v43 = vpack.c.bf16 %v760_v44, %v757_v49  ;;  %v1026_v47 = vpack.c.bf16 %v888_v50, %v885_v48  ;;  %2372 = vmatprep.subr.bf16.mxu1 %v1011_v61  ;;  %2484 = vmatprep.subr.bf16.mxu0 %v1027_v60  ;;  %v1017_v44 = vpack.c.bf16 %v3110_v7, %v3102_v3  ;;  %v3332_v3 = vld [vmem:[#allocation3_spill] sm:$0xff]  ;;  %v3335_v62 = vld [vmem:[#allocation4_spill] sm:$0xff]  ;;  %v3338_v7 = vld [vmem:[#allocation5_spill] sm:$0xff] }
 0x12d   : > { %2373 = vmatpush3.bf16.msra.mxu1 %v1003_v45  ;;  %2485 = vmatpush3.bf16.msra.mxu0 %v1019_v51  ;;  %v1008_v48 = vpack.c.bf16 %v744_v40, %v741_v36  ;;  %v1024_v49 = vpack.c.bf16 %v872_v41, %v869_v37  ;;  %v1007_v45 = vpack.c.bf16 %v2635_v30, %v2634_v26  ;;  %v2780_v24 = vld [vmem:[%s3048_s11 + $0x84] ss:$16 sps:$4 sm:$0xff]   ;;  %v2784_v26 = vld [vmem:[%s3048_s11 + $0x80] ss:$16 sps:$4 sm:$0xff]   ;;  %v2800_v37 = vld [vmem:[%s3048_s11 + $0xec] ss:$16 sps:$4 sm:$0xff]  }
 0x12e   : > { %2374 = vmatprep.subr.bf16.mxu1 %v1010_v43  ;;  %2486 = vmatprep.subr.bf16.mxu0 %v1026_v47  ;;  %v1000_v43 = vpack.c.bf16 %v3112_v8, %v3104_v4  ;;  %v1006_v47 = vpack.c.bf16 %v728_v32, %v725_v28  ;;  %v1022_v50 = vpack.c.bf16 %v856_v33, %v853_v29  ;;  %v2786_v28 = vld [vmem:[%s3048_s11 + $0xa4] ss:$16 sps:$4 sm:$0xff]   ;;  %v2788_v29 = vld [vmem:[%s3048_s11 + $0xac] ss:$16 sps:$4 sm:$0xff]   ;;  %v2790_v30 = vld [vmem:[%s3048_s11 + $0xa0] ss:$16 sps:$4 sm:$0xff]  }
 0x12f   : > { %v3325_v51 = vpack.c.bf16 %v3084_v58, %v3076_v54  ;;  %v1005_v60 = vpack.c.bf16 %v3124_v22, %v3116_v18  ;;  %v1021_v61 = vpack.c.bf16 %v3126_v23, %v3118_v19  ;;  %v3328_v54 = vpack.c.bf16 %v3094_v63, %v3082_v57  ;;  %v3329_v58 = vld [vmem:[#allocation11_spill] sm:$0xff]  ;;  %v2759_v63 = vld [vmem:[%s3048_s11 + $0x8] ss:$16 sps:$4 sm:$0xff]   ;;  %v2794_v33 = vld [vmem:[%s3048_s11 + $0xcc] ss:$16 sps:$4 sm:$0xff]  }
 0x130   : > { %v1020_v1 = vpack.c.bf16 %v3330_v59, %v3329_v58  ;;  %v3333_v4 = vpack.c.bf16 %v3331_v2, %v3332_v3  ;;  %v2756_v57 = vld [vmem:[%s3048_s11] ss:$16 sps:$4 sm:$0xff]   ;;  %v3339_v8 = vpack.c.bf16 %v3337_v6, %v3338_v7  ;;  %v2773_v19 = vld [vmem:[%s3048_s11 + $0x48] ss:$16 sps:$4 sm:$0xff]   ;;  %v2792_v32 = vld [vmem:[%s3048_s11 + $0xc4] ss:$16 sps:$4 sm:$0xff]  }
 0x131   : > { %2375 = vmatpush3.bf16.msra.mxu1 %v1002_v42  ;;  %2487 = vmatpush3.bf16.msra.mxu0 %v1018_v46  ;;  %v1016_v42 = vpack.c.bf16 %v3114_v9, %v3106_v5  ;;  %v1023_v46 = vpack.c.bf16 %v2667_v31, %v2666_v27  ;;  %v3336_v5 = vpack.c.bf16 %v3334_v56, %v3335_v62  ;;  %v3340_v9 = vld [vmem:[#allocation10_spill] sm:$0xff]  ;;  %v2772_v18 = vld [vmem:[%s3048_s11 + $0x40] ss:$16 sps:$4 sm:$0xff]   ;;  %v2798_v36 = vld [vmem:[%s3048_s11 + $0xe4] ss:$16 sps:$4 sm:$0xff]  }
 0x132   : > { %2376 = vmatprep.subr.bf16.mxu1 %v1009_v25  ;;  %2488 = vmatprep.subr.bf16.mxu0 %v1025_v21  ;;  %v3342_v11 = vpack.c.bf16 %v3340_v9, %v3341_v10  ;;  %v2776_v21 = vld [vmem:[%s3048_s11 + $0x6c] ss:$16 sps:$4 sm:$0xff]   ;;  %v2778_v22 = vld [vmem:[%s3048_s11 + $0x60] ss:$16 sps:$4 sm:$0xff]   ;;  %v2779_v23 = vld [vmem:[%s3048_s11 + $0x68] ss:$16 sps:$4 sm:$0xff]  }
 0x133   : > { %v2782_v25 = vld [vmem:[%s3048_s11 + $0x8c] ss:$16 sps:$4 sm:$0xff]   ;;  %v2785_v27 = vld [vmem:[%s3048_s11 + $0x88] ss:$16 sps:$4 sm:$0xff]   ;;  %v2804_v40 = vld [vmem:[%s3048_s11 + $0x104] ss:$16 sps:$4 sm:$0xff]  }
 0x134   : > { %v2791_v31 = vld [vmem:[%s3048_s11 + $0xa8] ss:$16 sps:$4 sm:$0xff]   ;;  %v2806_v41 = vld [vmem:[%s3048_s11 + $0x10c] ss:$16 sps:$4 sm:$0xff]   ;;  %v2834_v59 = vld [vmem:[%s3048_s11 + $0x1a4] ss:$16 sps:$4 sm:$0xff]  }
 0x135   : > { %2377 = vmatpush3.bf16.msra.mxu1 %v1001_v52  ;;  %2489 = vmatpush3.bf16.msra.mxu0 %v1017_v44  ;;  %v2808_v52 = vld [vmem:[%s3048_s11 + $0x100] ss:$16 sps:$4 sm:$0xff]   ;;  %v2809_v44 = vld [vmem:[%s3048_s11 + $0x108] ss:$16 sps:$4 sm:$0xff]   ;;  %v2842_v56 = vld [vmem:[%s3048_s11 + $0x1cc] ss:$16 sps:$4 sm:$0xff]  }
 0x136   : > { %2378 = vmatprep.subr.bf16.mxu1 %v1008_v48  ;;  %2490 = vmatprep.subr.bf16.mxu0 %v1024_v49  ;;  %v2810_v48 = vld [vmem:[%s3048_s11 + $0x124] ss:$16 sps:$4 sm:$0xff]   ;;  %v2812_v49 = vld [vmem:[%s3048_s11 + $0x12c] ss:$16 sps:$4 sm:$0xff]   ;;  %v2833_v58 = vld [vmem:[%s3048_s11 + $0x188] ss:$16 sps:$4 sm:$0xff]  }
 0x137   : > { %v2838_v2 = vld [vmem:[%s3048_s11 + $0x1a0] ss:$16 sps:$4 sm:$0xff]   ;;  %v2839_v3 = vld [vmem:[%s3048_s11 + $0x1a8] ss:$16 sps:$4 sm:$0xff]  }
 0x138   : > { %v2844_v62 = vld [vmem:[%s3048_s11 + $0x1c0] ss:$16 sps:$4 sm:$0xff]   ;;  %v2851_v7 = vld [vmem:[%s3048_s11 + $0x1e8] ss:$16 sps:$4 sm:$0xff]  }
 0x139   : > { %2379 = vmatpush3.bf16.msra.mxu1 %v1000_v43  ;;  %2491 = vmatpush3.bf16.msra.mxu0 %v1016_v42  ;;  %v2814_v43 = vld [vmem:[%s3048_s11 + $0x120] ss:$16 sps:$4 sm:$0xff]   ;;  %v2815_v42 = vld [vmem:[%s3048_s11 + $0x128] ss:$16 sps:$4 sm:$0xff]  }
 0x13a   : > { %2380 = vmatprep.subr.bf16.mxu1 %v1007_v45  ;;  %2492 = vmatprep.subr.bf16.mxu0 %v1023_v46  ;;  %v2816_v45 = vld [vmem:[%s3048_s11 + $0x144] ss:$16 sps:$4 sm:$0xff]   ;;  %v2818_v46 = vld [vmem:[%s3048_s11 + $0x14c] ss:$16 sps:$4 sm:$0xff]   ;;  %v2850_v6 = vld [vmem:[%s3048_s11 + $0x1e0] ss:$16 sps:$4 sm:$0xff]  }
 0x13d   : > { %2381 = vmatpush3.bf16.msra.mxu1 %v3325_v51  ;;  %2493 = vmatpush3.bf16.msra.mxu0 %v3326_v53  ;;  %v2822_v51 = vld [vmem:[%s3048_s11 + $0x164] ss:$16 sps:$4 sm:$0xff]   ;;  %v2824_v53 = vld [vmem:[%s3048_s11 + $0x16c] ss:$16 sps:$4 sm:$0xff]  }
 0x13e   : > { %2382 = vmatprep.subr.bf16.mxu1 %v1006_v47  ;;  %2494 = vmatprep.subr.bf16.mxu0 %v1022_v50  ;;  %v2820_v47 = vld [vmem:[%s3048_s11 + $0x140] ss:$16 sps:$4 sm:$0xff]   ;;  %v2821_v50 = vld [vmem:[%s3048_s11 + $0x148] ss:$16 sps:$4 sm:$0xff]  }
 0x141   : > { %2383 = vmatpush3.bf16.msra.mxu1 %v3327_v0  ;;  %2495 = vmatpush3.bf16.msra.mxu0 %v3328_v54  ;;  %v2828_v0 = vld [vmem:[%s3048_s11 + $0x184] ss:$16 sps:$4 sm:$0xff]   ;;  %v2830_v54 = vld [vmem:[%s3048_s11 + $0x18c] ss:$16 sps:$4 sm:$0xff]  }
 0x142   : > { %2384 = vmatprep.subr.bf16.mxu1 %v1005_v60  ;;  %2496 = vmatprep.subr.bf16.mxu0 %v1021_v61  ;;  %v2826_v60 = vld [vmem:[%s3048_s11 + $0x160] ss:$16 sps:$4 sm:$0xff]   ;;  %v2827_v61 = vld [vmem:[%s3048_s11 + $0x168] ss:$16 sps:$4 sm:$0xff]  }
 0x145   : > { %2385 = vmatpush3.bf16.msra.mxu1 %v3333_v4  ;;  %2497 = vmatpush3.bf16.msra.mxu0 %v3336_v5  ;;  %v2840_v4 = vld [vmem:[%s3048_s11 + $0x1c4] ss:$16 sps:$4 sm:$0xff]   ;;  %v2845_v5 = vld [vmem:[%s3048_s11 + $0x1c8] ss:$16 sps:$4 sm:$0xff]  }
 0x146   : > { %2386 = vmatprep.subr.bf16.mxu1 %v1004_v55  ;;  %2498 = vmatprep.subr.bf16.mxu0 %v1020_v1  ;;  %v2832_v55 = vld [vmem:[%s3048_s11 + $0x180] ss:$16 sps:$4 sm:$0xff]   ;;  %v2836_v1 = vld [vmem:[%s3048_s11 + $0x1ac] ss:$16 sps:$4 sm:$0xff]  }
 0x149   : > { %2387 = vmatpush3.bf16.msra.mxu1 %v3339_v8  ;;  %2499 = vmatpush3.bf16.msra.mxu0 %v3342_v11 }
 0x14c   : > { %1381 = vmatmul.mubr.bf16.vlgmr.msra.gmra.mxu1 %v2756_v57  ;;  %1542 = vmatmul.mubr.bf16.vlgmr.msra.gmra.mxu0 %v2759_v63  ;;  %v2846_v57 = vld [vmem:[%s3048_s11 + $0x1e4] ss:$16 sps:$4 sm:$0xff]   ;;  %v2848_v63 = vld [vmem:[%s3048_s11 + $0x1ec] ss:$16 sps:$4 sm:$0xff]  }
 0x14d   : > { %1388 = vmatprep.mubr.bf16.mxu1 %v2762_v12  ;;  %1549 = vmatprep.mubr.bf16.mxu0 %v2764_v13 }
 0x154   : > { %1389 = vmatmul.mubr.bf16.gmra.mxu1 %v2766_v14  ;;  %1550 = vmatmul.mubr.bf16.gmra.mxu0 %v2767_v15 }
 0x155   : > { %1396 = vmatprep.mubr.bf16.mxu1 %v2768_v16  ;;  %1557 = vmatprep.mubr.bf16.mxu0 %v2770_v17 }
 0x15c   : > { %1397 = vmatmul.mubr.bf16.gmra.mxu1 %v2772_v18  ;;  %1558 = vmatmul.mubr.bf16.gmra.mxu0 %v2773_v19 }
 0x15d   : > { %1404 = vmatprep.mubr.bf16.mxu1 %v2774_v20  ;;  %1565 = vmatprep.mubr.bf16.mxu0 %v2776_v21  ;;  %v3237_v21 = vld [vmem:[%s3305_s3] ss:$0 sm:$0xff] }
 0x164   : > { %1405 = vmatmul.mubr.bf16.gmra.mxu1 %v2778_v22  ;;  %1566 = vmatmul.mubr.bf16.gmra.mxu0 %v2779_v23 }
 0x165   : > { %1412 = vmatprep.mubr.bf16.mxu1 %v2780_v24  ;;  %1573 = vmatprep.mubr.bf16.mxu0 %v2782_v25 }
 0x16c   : > { %1413 = vmatmul.mubr.bf16.gmra.mxu1 %v2784_v26  ;;  %1574 = vmatmul.mubr.bf16.gmra.mxu0 %v2785_v27 }
 0x16d   : > { %1420 = vmatprep.mubr.bf16.mxu1 %v2786_v28  ;;  %1581 = vmatprep.mubr.bf16.mxu0 %v2788_v29 }
 0x174   : > { %1421 = vmatmul.mubr.bf16.gmra.mxu1 %v2790_v30  ;;  %1582 = vmatmul.mubr.bf16.gmra.mxu0 %v2791_v31 }
 0x175   : > { %1428 = vmatprep.mubr.bf16.mxu1 %v2792_v32  ;;  %1589 = vmatprep.mubr.bf16.mxu0 %v2794_v33 }
 0x17c   : > { %1429 = vmatmul.mubr.bf16.gmra.mxu1 %v2796_v34  ;;  %1590 = vmatmul.mubr.bf16.gmra.mxu0 %v2797_v35 }
 0x17d   : > { %1436 = vmatprep.mubr.bf16.mxu1 %v2798_v36  ;;  %1597 = vmatprep.mubr.bf16.mxu0 %v2800_v37 }
 0x184   : > { %1437 = vmatmul.mubr.bf16.gmra.mxu1 %v2802_v38  ;;  %1598 = vmatmul.mubr.bf16.gmra.mxu0 %v2803_v39 }
 0x185   : > { %1444 = vmatprep.mubr.bf16.mxu1 %v2804_v40  ;;  %1605 = vmatprep.mubr.bf16.mxu0 %v2806_v41 }
 0x18c   : > { %1445 = vmatmul.mubr.bf16.gmra.mxu1 %v2808_v52  ;;  %1606 = vmatmul.mubr.bf16.gmra.mxu0 %v2809_v44 }
 0x18d   : > { %1452 = vmatprep.mubr.bf16.mxu1 %v2810_v48  ;;  %1613 = vmatprep.mubr.bf16.mxu0 %v2812_v49 }
 0x194   : > { %1453 = vmatmul.mubr.bf16.gmra.mxu1 %v2814_v43  ;;  %1614 = vmatmul.mubr.bf16.gmra.mxu0 %v2815_v42 }
 0x195   : > { %1460 = vmatprep.mubr.bf16.mxu1 %v2816_v45  ;;  %1621 = vmatprep.mubr.bf16.mxu0 %v2818_v46 }
 0x19c   : > { %1461 = vmatmul.mubr.bf16.gmra.mxu1 %v2820_v47  ;;  %1622 = vmatmul.mubr.bf16.gmra.mxu0 %v2821_v50 }
 0x19d   : > { %1468 = vmatprep.mubr.bf16.mxu1 %v2822_v51  ;;  %1629 = vmatprep.mubr.bf16.mxu0 %v2824_v53 }
 0x1a4   : > { %1469 = vmatmul.mubr.bf16.gmra.mxu1 %v2826_v60  ;;  %1630 = vmatmul.mubr.bf16.gmra.mxu0 %v2827_v61 }
 0x1a5   : > { %1476 = vmatprep.mubr.bf16.mxu1 %v2828_v0  ;;  %1637 = vmatprep.mubr.bf16.mxu0 %v2830_v54 }
 0x1ac   : > { %1477 = vmatmul.mubr.bf16.gmra.mxu1 %v2832_v55  ;;  %1638 = vmatmul.mubr.bf16.gmra.mxu0 %v2833_v58 }
 0x1ad   : > { %1484 = vmatprep.mubr.bf16.mxu1 %v2834_v59  ;;  %1645 = vmatprep.mubr.bf16.mxu0 %v2836_v1 }
 0x1b4   : > { %1485 = vmatmul.mubr.bf16.gmra.mxu1 %v2838_v2  ;;  %1646 = vmatmul.mubr.bf16.gmra.mxu0 %v2839_v3 }
 0x1b5   : > { %1492 = vmatprep.mubr.bf16.mxu1 %v2840_v4  ;;  %1653 = vmatprep.mubr.bf16.mxu0 %v2842_v56 }
 0x1bc   : > { %1493 = vmatmul.mubr.bf16.gmra.mxu1 %v2844_v62  ;;  %1654 = vmatmul.mubr.bf16.gmra.mxu0 %v2845_v5 }
 0x1bd   : > { %1500 = vmatprep.mubr.bf16.mxu1 %v2846_v57  ;;  %1661 = vmatprep.mubr.bf16.mxu0 %v2848_v63 }
 0x1c4   : > { %1501 = vmatmul.mubr.bf16.gmra.mxu1 %v2850_v6  ;;  %1662 = vmatmul.mubr.bf16.gmra.mxu0 %v2851_v7 }
 0x20c   : > { %v2388_v8 = vpop.f32.mrf.mxu1  ;;  %v2500_v9 = vpop.f32.mrf.mxu0 }
 0x20e   : > { %v2389_v10 = vpop.f32.mrf.mxu1  ;;  %v2501_v11 = vpop.f32.mrf.mxu0 }
 0x20f   : > { %v2390_v12 = vadd.f32 %v2389_v10, %v2388_v8  ;;  %v2502_v13 = vadd.f32 %v2501_v11, %v2500_v9 }
 0x210   : > { %v2391_v14 = vpop.f32.mrf.mxu1  ;;  %v2503_v15 = vpop.f32.mrf.mxu0 }
 0x211   : > { %v1544_v18 = vadd.f32 %v2502_v13, %v2390_v12 }
 0x212   : > { %v2392_v16 = vpop.f32.mrf.mxu1  ;;  %v2504_v17 = vpop.f32.mrf.mxu0 }
 0x213   : > { %v2393_v19 = vadd.f32 %v2392_v16, %v2391_v14  ;;  %v2505_v20 = vadd.f32 %v2504_v17, %v2503_v15  ;;  %v1776_v27 = vadd.f32 %v3237_v21, %v1544_v18 }
 0x214   : > { %v2394_v22 = vpop.f32.mrf.mxu1  ;;  %v2506_v23 = vpop.f32.mrf.mxu0 }
 0x215   : > { %v1547_v24 = vadd.f32 %v2505_v20, %v2393_v19 }
 0x216   : > { %v2395_v25 = vpop.f32.mrf.mxu1  ;;  %v2507_v26 = vpop.f32.mrf.mxu0 }
 0x217   : > { %v1777_v28 = vadd.f32 %v3237_v21, %v1547_v24  ;;  %v2396_v29 = vadd.f32 %v2395_v25, %v2394_v22  ;;  %v2508_v30 = vadd.f32 %v2507_v26, %v2506_v23 }
 0x218   : > { %v2397_v31 = vpop.f32.mrf.mxu1  ;;  %v2509_v32 = vpop.f32.mrf.mxu0 }
 0x219   : > { %v2240_v33 = vpack.c.bf16 %v1777_v28, %v1776_v27  ;;  %v1552_v36 = vadd.f32 %v2508_v30, %v2396_v29 }
 0x21a   : > { %v2398_v34 = vpop.f32.mrf.mxu1  ;;  %v2510_v35 = vpop.f32.mrf.mxu0 }
 0x21b   : > { %2241 = vst [vmem:[%s3245_s20] sm:$0xff] %v2240_v33   ;;  %v2399_v37 = vadd.f32 %v2398_v34, %v2397_v31  ;;  %v2511_v38 = vadd.f32 %v2510_v35, %v2509_v32  ;;  %v1778_v48 = vadd.f32 %v3237_v21, %v1552_v36 }
 0x21c   : > { %v2400_v39 = vpop.f32.mrf.mxu1  ;;  %v2512_v40 = vpop.f32.mrf.mxu0 }
 0x21d   : > { %v1555_v41 = vadd.f32 %v2511_v38, %v2399_v37 }
 0x21e   : > { %v2401_v52 = vpop.f32.mrf.mxu1  ;;  %v2513_v44 = vpop.f32.mrf.mxu0 }
 0x21f   : > { %v1779_v49 = vadd.f32 %v3237_v21, %v1555_v41  ;;  %v2402_v43 = vadd.f32 %v2401_v52, %v2400_v39  ;;  %v2514_v42 = vadd.f32 %v2513_v44, %v2512_v40 }
 0x220   : > { %v2403_v45 = vpop.f32.mrf.mxu1  ;;  %v2515_v46 = vpop.f32.mrf.mxu0 }
 0x221   : > { %v2245_v47 = vpack.c.bf16 %v1779_v49, %v1778_v48  ;;  %v1560_v53 = vadd.f32 %v2514_v42, %v2402_v43 }
 0x222   : > { %v2404_v50 = vpop.f32.mrf.mxu1  ;;  %v2516_v51 = vpop.f32.mrf.mxu0 }
 0x223   : > { %2317 = vst [vmem:[%s3245_s20 + $0x8] sm:$0xff] %v2245_v47   ;;  %v2405_v60 = vadd.f32 %v2404_v50, %v2403_v45  ;;  %v2517_v61 = vadd.f32 %v2516_v51, %v2515_v46  ;;  %v1780_v1 = vadd.f32 %v3237_v21, %v1560_v53 }
 0x224   : > { %v2406_v0 = vpop.f32.mrf.mxu1  ;;  %v2518_v54 = vpop.f32.mrf.mxu0 }
 0x225   : > { %v1563_v55 = vadd.f32 %v2517_v61, %v2405_v60 }
 0x226   : > { %v2407_v58 = vpop.f32.mrf.mxu1  ;;  %v2519_v59 = vpop.f32.mrf.mxu0 }
 0x227   : > { %v1781_v2 = vadd.f32 %v3237_v21, %v1563_v55  ;;  %v2408_v3 = vadd.f32 %v2407_v58, %v2406_v0  ;;  %v2520_v4 = vadd.f32 %v2519_v59, %v2518_v54 }
 0x228   : > { %v2409_v56 = vpop.f32.mrf.mxu1  ;;  %v2521_v62 = vpop.f32.mrf.mxu0 }
 0x229   : > { %v2250_v5 = vpack.c.bf16 %v1781_v2, %v1780_v1  ;;  %v1568_v6 = vadd.f32 %v2520_v4, %v2408_v3 }
 0x22a   : > { %v2410_v57 = vpop.f32.mrf.mxu1  ;;  %v2522_v63 = vpop.f32.mrf.mxu0 }
 0x22b   : > { %2318 = vst [vmem:[%s3245_s20 + $0x10] sm:$0xff] %v2250_v5   ;;  %v2411_v7 = vadd.f32 %v2410_v57, %v2409_v56  ;;  %v2523_v8 = vadd.f32 %v2522_v63, %v2521_v62  ;;  %v1782_v14 = vadd.f32 %v3237_v21, %v1568_v6 }
 0x22c   : > { %v2412_v9 = vpop.f32.mrf.mxu1  ;;  %v2524_v10 = vpop.f32.mrf.mxu0 }
 0x22d   : > { %v1571_v11 = vadd.f32 %v2523_v8, %v2411_v7 }
 0x22e   : > { %v2413_v12 = vpop.f32.mrf.mxu1  ;;  %v2525_v13 = vpop.f32.mrf.mxu0 }
 0x22f   : > { %v1783_v15 = vadd.f32 %v3237_v21, %v1571_v11  ;;  %v2414_v16 = vadd.f32 %v2413_v12, %v2412_v9  ;;  %v2526_v17 = vadd.f32 %v2525_v13, %v2524_v10 }
 0x230   : > { %v2415_v18 = vpop.f32.mrf.mxu1  ;;  %v2527_v19 = vpop.f32.mrf.mxu0 }
 0x231   : > { %v2255_v20 = vpack.c.bf16 %v1783_v15, %v1782_v14  ;;  %v1576_v24 = vadd.f32 %v2526_v17, %v2414_v16 }
 0x232   : > { %v2416_v22 = vpop.f32.mrf.mxu1  ;;  %v2528_v23 = vpop.f32.mrf.mxu0 }
 0x233   : > { %2319 = vst [vmem:[%s3245_s20 + $0x18] sm:$0xff] %v2255_v20   ;;  %v2417_v25 = vadd.f32 %v2416_v22, %v2415_v18  ;;  %v2529_v26 = vadd.f32 %v2528_v23, %v2527_v19  ;;  %v1784_v32 = vadd.f32 %v3237_v21, %v1576_v24 }
 0x234   : > { %v2418_v27 = vpop.f32.mrf.mxu1  ;;  %v2530_v28 = vpop.f32.mrf.mxu0 }
 0x235   : > { %v1579_v29 = vadd.f32 %v2529_v26, %v2417_v25 }
 0x236   : > { %v2419_v30 = vpop.f32.mrf.mxu1  ;;  %v2531_v31 = vpop.f32.mrf.mxu0 }
 0x237   : > { %v1785_v33 = vadd.f32 %v3237_v21, %v1579_v29  ;;  %v2420_v34 = vadd.f32 %v2419_v30, %v2418_v27  ;;  %v2532_v35 = vadd.f32 %v2531_v31, %v2530_v28 }
 0x238   : > { %v2421_v36 = vpop.f32.mrf.mxu1  ;;  %v2533_v37 = vpop.f32.mrf.mxu0 }
 0x239   : > { %v2260_v38 = vpack.c.bf16 %v1785_v33, %v1784_v32  ;;  %v1584_v41 = vadd.f32 %v2532_v35, %v2420_v34 }
 0x23a   : > { %v2422_v39 = vpop.f32.mrf.mxu1  ;;  %v2534_v40 = vpop.f32.mrf.mxu0 }
 0x23b   : > { %2320 = vst [vmem:[%s3245_s20 + $0x20] sm:$0xff] %v2260_v38   ;;  %v2423_v52 = vadd.f32 %v2422_v39, %v2421_v36  ;;  %v2535_v44 = vadd.f32 %v2534_v40, %v2533_v37  ;;  %v1786_v46 = vadd.f32 %v3237_v21, %v1584_v41 }
 0x23c   : > { %v2424_v48 = vpop.f32.mrf.mxu1  ;;  %v2536_v49 = vpop.f32.mrf.mxu0 }
 0x23d   : > { %v1587_v43 = vadd.f32 %v2535_v44, %v2423_v52 }
 0x23e   : > { %v2425_v42 = vpop.f32.mrf.mxu1  ;;  %v2537_v45 = vpop.f32.mrf.mxu0 }
 0x23f   : > { %v1787_v47 = vadd.f32 %v3237_v21, %v1587_v43  ;;  %v2426_v50 = vadd.f32 %v2425_v42, %v2424_v48  ;;  %v2538_v51 = vadd.f32 %v2537_v45, %v2536_v49 }
 0x240   : > { %v2427_v53 = vpop.f32.mrf.mxu1  ;;  %v2539_v60 = vpop.f32.mrf.mxu0 }
 0x241   : > { %v2265_v61 = vpack.c.bf16 %v1787_v47, %v1786_v46  ;;  %v1592_v55 = vadd.f32 %v2538_v51, %v2426_v50 }
 0x242   : > { %v2428_v0 = vpop.f32.mrf.mxu1  ;;  %v2540_v54 = vpop.f32.mrf.mxu0 }
 0x243   : > { %2321 = vst [vmem:[%s3245_s20 + $0x28] sm:$0xff] %v2265_v61   ;;  %v2429_v58 = vadd.f32 %v2428_v0, %v2427_v53  ;;  %v2541_v59 = vadd.f32 %v2540_v54, %v2539_v60  ;;  %v1788_v62 = vadd.f32 %v3237_v21, %v1592_v55 }
 0x244   : > { %v2430_v1 = vpop.f32.mrf.mxu1  ;;  %v2542_v2 = vpop.f32.mrf.mxu0 }
 0x245   : > { %v1595_v3 = vadd.f32 %v2541_v59, %v2429_v58 }
 0x246   : > { %v2431_v4 = vpop.f32.mrf.mxu1  ;;  %v2543_v56 = vpop.f32.mrf.mxu0 }
 0x247   : > { %v1789_v5 = vadd.f32 %v3237_v21, %v1595_v3  ;;  %v2432_v57 = vadd.f32 %v2431_v4, %v2430_v1  ;;  %v2544_v63 = vadd.f32 %v2543_v56, %v2542_v2 }
 0x248   : > { %v2433_v6 = vpop.f32.mrf.mxu1  ;;  %v2545_v7 = vpop.f32.mrf.mxu0 }
 0x249   : > { %v2270_v8 = vpack.c.bf16 %v1789_v5, %v1788_v62  ;;  %v1600_v11 = vadd.f32 %v2544_v63, %v2432_v57 }
 0x24a   : > { %v2434_v9 = vpop.f32.mrf.mxu1  ;;  %v2546_v10 = vpop.f32.mrf.mxu0 }
 0x24b   : > { %2322 = vst [vmem:[%s3245_s20 + $0x30] sm:$0xff] %v2270_v8   ;;  %v2435_v12 = vadd.f32 %v2434_v9, %v2433_v6  ;;  %v2547_v13 = vadd.f32 %v2546_v10, %v2545_v7  ;;  %v1790_v19 = vadd.f32 %v3237_v21, %v1600_v11 }
 0x24c   : > { %v2436_v14 = vpop.f32.mrf.mxu1  ;;  %v2548_v15 = vpop.f32.mrf.mxu0 }
 0x24d   : > { %v1603_v16 = vadd.f32 %v2547_v13, %v2435_v12 }
 0x24e   : > { %v2437_v17 = vpop.f32.mrf.mxu1  ;;  %v2549_v18 = vpop.f32.mrf.mxu0 }
 0x24f   : > { %v1791_v20 = vadd.f32 %v3237_v21, %v1603_v16  ;;  %v2438_v22 = vadd.f32 %v2437_v17, %v2436_v14  ;;  %v2550_v23 = vadd.f32 %v2549_v18, %v2548_v15 }
 0x250   : > { %v2439_v24 = vpop.f32.mrf.mxu1  ;;  %v2551_v25 = vpop.f32.mrf.mxu0 }
 0x251   : > { %v2275_v26 = vpack.c.bf16 %v1791_v20, %v1790_v19  ;;  %v1608_v29 = vadd.f32 %v2550_v23, %v2438_v22 }
 0x252   : > { %v2440_v27 = vpop.f32.mrf.mxu1  ;;  %v2552_v28 = vpop.f32.mrf.mxu0 }
 0x253   : > { %2323 = vst [vmem:[%s3245_s20 + $0x38] sm:$0xff] %v2275_v26   ;;  %v2441_v30 = vadd.f32 %v2440_v27, %v2439_v24  ;;  %v2553_v31 = vadd.f32 %v2552_v28, %v2551_v25  ;;  %v1792_v37 = vadd.f32 %v3237_v21, %v1608_v29 }
 0x254   : > { %v2442_v32 = vpop.f32.mrf.mxu1  ;;  %v2554_v33 = vpop.f32.mrf.mxu0 }
 0x255   : > { %v1611_v34 = vadd.f32 %v2553_v31, %v2441_v30 }
 0x256   : > { %v2443_v35 = vpop.f32.mrf.mxu1  ;;  %v2555_v36 = vpop.f32.mrf.mxu0 }
 0x257   : > { %v1793_v38 = vadd.f32 %v3237_v21, %v1611_v34  ;;  %v2444_v39 = vadd.f32 %v2443_v35, %v2442_v32  ;;  %v2556_v40 = vadd.f32 %v2555_v36, %v2554_v33 }
 0x258   : > { %v2445_v41 = vpop.f32.mrf.mxu1  ;;  %v2557_v52 = vpop.f32.mrf.mxu0 }
 0x259   : > { %v2280_v44 = vpack.c.bf16 %v1793_v38, %v1792_v37  ;;  %v1616_v43 = vadd.f32 %v2556_v40, %v2444_v39 }
 0x25a   : > { %v2446_v48 = vpop.f32.mrf.mxu1  ;;  %v2558_v49 = vpop.f32.mrf.mxu0 }
 0x25b   : > { %2324 = vst [vmem:[%s3245_s20 + $0x40] sm:$0xff] %v2280_v44   ;;  %v2447_v42 = vadd.f32 %v2446_v48, %v2445_v41  ;;  %v2559_v45 = vadd.f32 %v2558_v49, %v2557_v52  ;;  %v1794_v60 = vadd.f32 %v3237_v21, %v1616_v43 }
 0x25c   : > { %v2448_v46 = vpop.f32.mrf.mxu1  ;;  %v2560_v47 = vpop.f32.mrf.mxu0 }
 0x25d   : > { %v1619_v50 = vadd.f32 %v2559_v45, %v2447_v42 }
 0x25e   : > { %v2449_v51 = vpop.f32.mrf.mxu1  ;;  %v2561_v53 = vpop.f32.mrf.mxu0 }
 0x25f   : > { %v1795_v61 = vadd.f32 %v3237_v21, %v1619_v50  ;;  %v2450_v0 = vadd.f32 %v2449_v51, %v2448_v46  ;;  %v2562_v54 = vadd.f32 %v2561_v53, %v2560_v47 }
 0x260   : > { %v2451_v55 = vpop.f32.mrf.mxu1  ;;  %v2563_v58 = vpop.f32.mrf.mxu0 }
 0x261   : > { %v2285_v59 = vpack.c.bf16 %v1795_v61, %v1794_v60  ;;  %v1624_v3 = vadd.f32 %v2562_v54, %v2450_v0 }
 0x262   : > { %v2452_v1 = vpop.f32.mrf.mxu1  ;;  %v2564_v2 = vpop.f32.mrf.mxu0 }
 0x263   : > { %2325 = vst [vmem:[%s3245_s20 + $0x48] sm:$0xff] %v2285_v59   ;;  %v2453_v4 = vadd.f32 %v2452_v1, %v2451_v55  ;;  %v2565_v56 = vadd.f32 %v2564_v2, %v2563_v58  ;;  %v1796_v7 = vadd.f32 %v3237_v21, %v1624_v3 }
 0x264   : > { %v2454_v62 = vpop.f32.mrf.mxu1  ;;  %v2566_v5 = vpop.f32.mrf.mxu0 }
 0x265   : > { %v1627_v57 = vadd.f32 %v2565_v56, %v2453_v4 }
 0x266   : > { %v2455_v63 = vpop.f32.mrf.mxu1  ;;  %v2567_v6 = vpop.f32.mrf.mxu0 }
 0x267   : > { %v1797_v8 = vadd.f32 %v3237_v21, %v1627_v57  ;;  %v2456_v9 = vadd.f32 %v2455_v63, %v2454_v62  ;;  %v2568_v10 = vadd.f32 %v2567_v6, %v2566_v5 }
 0x268   : > { %v2457_v11 = vpop.f32.mrf.mxu1  ;;  %v2569_v12 = vpop.f32.mrf.mxu0 }
 0x269   : > { %v2290_v13 = vpack.c.bf16 %v1797_v8, %v1796_v7  ;;  %v1632_v16 = vadd.f32 %v2568_v10, %v2456_v9 }
 0x26a   : > { %v2458_v14 = vpop.f32.mrf.mxu1  ;;  %v2570_v15 = vpop.f32.mrf.mxu0 }
 0x26b   : > { %2326 = vst [vmem:[%s3245_s20 + $0x50] sm:$0xff] %v2290_v13   ;;  %v2459_v17 = vadd.f32 %v2458_v14, %v2457_v11  ;;  %v2571_v18 = vadd.f32 %v2570_v15, %v2569_v12  ;;  %v1798_v25 = vadd.f32 %v3237_v21, %v1632_v16 }
 0x26c   : > { %v2460_v19 = vpop.f32.mrf.mxu1  ;;  %v2572_v20 = vpop.f32.mrf.mxu0 }
 0x26d   : > { %v1635_v22 = vadd.f32 %v2571_v18, %v2459_v17 }
 0x26e   : > { %v2461_v23 = vpop.f32.mrf.mxu1  ;;  %v2573_v24 = vpop.f32.mrf.mxu0 }
 0x26f   : > { %v1799_v26 = vadd.f32 %v3237_v21, %v1635_v22  ;;  %v2462_v27 = vadd.f32 %v2461_v23, %v2460_v19  ;;  %v2574_v28 = vadd.f32 %v2573_v24, %v2572_v20 }
 0x270   : > { %v2463_v29 = vpop.f32.mrf.mxu1  ;;  %v2575_v30 = vpop.f32.mrf.mxu0 }
 0x271   : > { %v2295_v31 = vpack.c.bf16 %v1799_v26, %v1798_v25  ;;  %v1640_v34 = vadd.f32 %v2574_v28, %v2462_v27 }
 0x272   : > { %v2464_v32 = vpop.f32.mrf.mxu1  ;;  %v2576_v33 = vpop.f32.mrf.mxu0 }
 0x273   : > { %2327 = vst [vmem:[%s3245_s20 + $0x58] sm:$0xff] %v2295_v31   ;;  %v2465_v35 = vadd.f32 %v2464_v32, %v2463_v29  ;;  %v2577_v36 = vadd.f32 %v2576_v33, %v2575_v30  ;;  %v1800_v52 = vadd.f32 %v3237_v21, %v1640_v34 }
 0x274   : > { %v2466_v37 = vpop.f32.mrf.mxu1  ;;  %v2578_v38 = vpop.f32.mrf.mxu0 }
 0x275   : > { %v1643_v39 = vadd.f32 %v2577_v36, %v2465_v35 }
 0x276   : > { %v2467_v40 = vpop.f32.mrf.mxu1  ;;  %v2579_v41 = vpop.f32.mrf.mxu0 }
 0x277   : > { %v1801_v44 = vadd.f32 %v3237_v21, %v1643_v39  ;;  %v2468_v48 = vadd.f32 %v2467_v40, %v2466_v37  ;;  %v2580_v49 = vadd.f32 %v2579_v41, %v2578_v38 }
 0x278   : > { %v2469_v43 = vpop.f32.mrf.mxu1  ;;  %v2581_v42 = vpop.f32.mrf.mxu0 }
 0x279   : > { %v2300_v45 = vpack.c.bf16 %v1801_v44, %v1800_v52  ;;  %v1648_v50 = vadd.f32 %v2580_v49, %v2468_v48 }
 0x27a   : > { %v2470_v46 = vpop.f32.mrf.mxu1  ;;  %v2582_v47 = vpop.f32.mrf.mxu0 }
 0x27b   : > { %2328 = vst [vmem:[%s3245_s20 + $0x60] sm:$0xff] %v2300_v45   ;;  %v2471_v51 = vadd.f32 %v2470_v46, %v2469_v43  ;;  %v2583_v53 = vadd.f32 %v2582_v47, %v2581_v42  ;;  %v1802_v58 = vadd.f32 %v3237_v21, %v1648_v50 }
 0x27c   : > { %v2472_v60 = vpop.f32.mrf.mxu1  ;;  %v2584_v61 = vpop.f32.mrf.mxu0 }
 0x27d   : > { %v1651_v0 = vadd.f32 %v2583_v53, %v2471_v51 }
 0x27e   : > { %v2473_v54 = vpop.f32.mrf.mxu1  ;;  %v2585_v55 = vpop.f32.mrf.mxu0 }
 0x27f   : > { %v1803_v59 = vadd.f32 %v3237_v21, %v1651_v0  ;;  %v2474_v1 = vadd.f32 %v2473_v54, %v2472_v60  ;;  %v2586_v2 = vadd.f32 %v2585_v55, %v2584_v61 }
 0x280   : > { %v2475_v3 = vpop.f32.mrf.mxu1  ;;  %v2587_v4 = vpop.f32.mrf.mxu0 }
 0x281   : > { %v2305_v56 = vpack.c.bf16 %v1803_v59, %v1802_v58  ;;  %v1656_v57 = vadd.f32 %v2586_v2, %v2474_v1 }
 0x282   : > { %v2476_v62 = vpop.f32.mrf.mxu1  ;;  %v2588_v5 = vpop.f32.mrf.mxu0 }
 0x283   : > { %2329 = vst [vmem:[%s3245_s20 + $0x68] sm:$0xff] %v2305_v56   ;;  %v2477_v63 = vadd.f32 %v2476_v62, %v2475_v3  ;;  %v2589_v6 = vadd.f32 %v2588_v5, %v2587_v4  ;;  %v1804_v12 = vadd.f32 %v3237_v21, %v1656_v57 }
 0x284   : > { %v2478_v7 = vpop.f32.mrf.mxu1  ;;  %v2590_v8 = vpop.f32.mrf.mxu0 }
 0x285   : > { %v1659_v9 = vadd.f32 %v2589_v6, %v2477_v63 }
 0x286   : > { %v2479_v10 = vpop.f32.mrf.mxu1  ;;  %v2591_v11 = vpop.f32.mrf.mxu0 }
 0x287   : > { %v1805_v13 = vadd.f32 %v3237_v21, %v1659_v9  ;;  %v2480_v14 = vadd.f32 %v2479_v10, %v2478_v7  ;;  %v2592_v15 = vadd.f32 %v2591_v11, %v2590_v8 }
 0x288   : > { %v2481_v16 = vpop.f32.mrf.mxu1  ;;  %v2593_v17 = vpop.f32.mrf.mxu0 }
 0x289   : > { %v2310_v18 = vpack.c.bf16 %v1805_v13, %v1804_v12  ;;  %v1664_v22 = vadd.f32 %v2592_v15, %v2480_v14 }
 0x28a   : > { %v2482_v19 = vpop.f32.mrf.mxu1  ;;  %v2594_v20 = vpop.f32.mrf.mxu0 }
 0x28b   : > { %2330 = vst [vmem:[%s3245_s20 + $0x70] sm:$0xff] %v2310_v18   ;;  %v2483_v23 = vadd.f32 %v2482_v19, %v2481_v16  ;;  %v2595_v24 = vadd.f32 %v2594_v20, %v2593_v17  ;;  %v1806_v26 = vadd.f32 %v3237_v21, %v1664_v22 }
 0x28d   : > { %v1667_v25 = vadd.f32 %v2595_v24, %v2483_v23 }
 0x28f   : > { %v1807_v27 = vadd.f32 %v3237_v21, %v1667_v25 }
 0x291   : > { %v2315_v28 = vpack.c.bf16 %v1807_v27, %v1806_v26 }
 0x293   : > { %2331 = vst [vmem:[%s3245_s20 + $0x78] sm:$0xff] %v2315_v28  }
 0x294 PF: > { %s14_s17 = sadd.s32 1, %s2874_s17   ;;  %s3343_s15 = smov %s2870_s16 }
 0x295   : > { %p11_p5 = scmp.ge.s32.totalorder %s14_s17, 4   ;;  %s3344_s16 = smov %s3346_s18 }
 0x297   :  { %13 = sbr.rel (!%p11_p5) target bundleno = 2 (0x2), region = 77 }

</bundles_post_ra>
